<compile_context>
chip_gen: v6e
topology: v6e:2x2x1
jax: 0.10.0
libtpu: 0.0.40
codegen_flags: <defaults>
</compile_context>

<pallas_src>
import functools

import jax
import jax.numpy as jnp
from jax.experimental import pallas as pl
from jax.experimental.pallas import tpu as pltpu

MAX_TILE_B = 512   # large tiles amortize per-grid-step overhead; >=256 fills the v6e/v7x MXU
POLICY_W = 128     # padded policy-logit lane block
OUT_W = 256        # lane-dense output: cols [0,128) = padded policy, col 128 = value


def _round_up(a, m):
    return ((a + m - 1) // m) * m


# --------------------------------------------------------------------------------------
# Kernel
# --------------------------------------------------------------------------------------
def _actor_critic_kernel(hidden, mxu_dtype,
                         x_ref, w1_ref, aw2_ref, ab2_ref,
                         w3_ref, b3_ref, cw2_ref, cb2_ref, out_ref):
    """One batch tile.

    x_ref   : (TILE_B, XW)           states | ones column (bias fold) | zero pad, XW % 128 == 0
    w1_ref  : (XW, hidden+128)       fused [critic_linear1 | actor_linear1] (+ bias row, zero pad)
    aw2_ref : (128, hidden)          actor_linear2 weights (mxu_dtype)
    ab2_ref : (1, hidden)            actor_linear2 bias (f32)
    w3_ref  : (hidden, 128)          actor_linear3 weights padded to 128 lanes (mxu_dtype)
    b3_ref  : (1, 128)               actor_linear3 bias, dead softmax lanes = -1e30 (f32)
    cw2_ref : (hidden, 128)          critic_linear2 weights in lane 0 (mxu_dtype)
    cb2_ref : (1, 128)               critic_linear2 bias in lane 0 (f32)
    out_ref : (TILE_B, 256)          cols [0,num_actions) = policy, col 128 = value
    """
    x = x_ref[...].astype(mxu_dtype)

    # ----- fused layer 1: [critic_linear1 | actor_linear1], bias folded via ones column -----
    z1 = jnp.maximum(jnp.dot(x, w1_ref[...], preferred_element_type=jnp.float32), 0.0)
    h = z1[:, :hidden]          # critic hidden      (TILE_B, hidden)
    a1 = z1[:, hidden:]         # actor hidden 1     (TILE_B, 128)

    # ----- actor layer 2 (bias + relu in f32) -----
    a2 = jnp.maximum(
        jnp.dot(a1.astype(mxu_dtype), aw2_ref[...], preferred_element_type=jnp.float32)
        + ab2_ref[...], 0.0)

    # ----- heads: two row-split N=128 lane-dense dots (no in-kernel concat) -----
    logits = jnp.dot(a2.astype(mxu_dtype), w3_ref[...],
                     preferred_element_type=jnp.float32) + b3_ref[...]
    value = jnp.dot(h.astype(mxu_dtype), cw2_ref[...],
                    preferred_element_type=jnp.float32) + cb2_ref[...]

    # exact softmax over the 128 policy lanes; padded lanes carry -1e30 bias -> exp == 0 exactly
    m = jnp.max(logits, axis=1, keepdims=True)
    e = jnp.exp(logits - m)
    s = jnp.sum(e, axis=1, keepdims=True)
    out_ref[:, 0:POLICY_W] = e / s              # exact divide: rows sum to 1 (f32 rounding)
    out_ref[:, POLICY_W:OUT_W] = value          # col 128 = critic value


# --------------------------------------------------------------------------------------
# Parameter packing (ONE-TIME, outside the step loop)
# --------------------------------------------------------------------------------------
def pack_params(p, num_inputs, num_actions, hidden, mxu_dtype=jnp.float32):
    """Pack/pad weights once. mxu_dtype=jnp.bfloat16 recommended on v6e/v7x, f32 on v5e."""
    assert num_actions <= POLICY_W, "policy block is 128 lanes wide"
    assert hidden % 128 == 0, "hidden must be a lane multiple for clean slicing"

    xw = _round_up(num_inputs + 1, 128)

    # Fused layer 1: rows [0,num_inputs) = weights, row num_inputs = bias, remaining rows = 0.
    w1f = jnp.zeros((xw, hidden + 128), jnp.float32)
    w1f = w1f.at[:num_inputs, :hidden].set(p["cw1"])
    w1f = w1f.at[:num_inputs, hidden:].set(p["aw1"])
    w1f = w1f.at[num_inputs, :hidden].set(p["cb1"][0])
    w1f = w1f.at[num_inputs, hidden:].set(p["ab1"][0])

    # Actor head: (hidden, 128) weights; bias has -1e30 on dead softmax lanes (must stay f32).
    w3p = jnp.zeros((hidden, POLICY_W), jnp.float32).at[:, :num_actions].set(p["aw3"])
    b3p = jnp.full((1, POLICY_W), -1e30, jnp.float32).at[0, :num_actions].set(p["ab3"][0])

    # Critic head: value column in lane 0.
    cw2p = jnp.zeros((hidden, POLICY_W), jnp.float32).at[:, 0:1].set(p["cw2"])
    cb2p = jnp.zeros((1, POLICY_W), jnp.float32).at[0, 0].set(p["cb2"][0, 0])

    return dict(
        w1f=w1f.astype(mxu_dtype),
        aw2=p["aw2"].astype(mxu_dtype),
        ab2=p["ab2"].astype(jnp.float32),
        w3p=w3p.astype(mxu_dtype),
        b3p=b3p,                       # f32: the -1e30 trick must not be quantized
        cw2p=cw2p.astype(mxu_dtype),
        cb2p=cb2p,                     # f32
    )


# --------------------------------------------------------------------------------------
# Forward wrapper
# --------------------------------------------------------------------------------------
@functools.partial(jax.jit, static_argnames=("num_actions",))
def actor_critic_forward(states, packed, *, num_actions):
    """states: (B, num_inputs) f32.  Returns (value (B,1), policy (B,num_actions))."""
    states = states.astype(jnp.float32)
    B, num_inputs = states.shape

    w1f, aw2, ab2 = packed["w1f"], packed["aw2"], packed["ab2"]
    w3p, b3p = packed["w3p"], packed["b3p"]
    cw2p, cb2p = packed["cw2p"], packed["cb2p"]
    xw = w1f.shape[0]
    hidden = aw2.shape[1]

    # Single-state act() path -> dedicated 8-row tile; large batches -> up to MAX_TILE_B rows.
    tile_b = min(MAX_TILE_B, _round_up(B, 8))
    bp = _round_up(B, tile_b)

    # x = [states | 1 | 0-pad] lane-padded to a 128 multiple, batch-padded to a tile multiple.
    x = jnp.zeros((bp, xw), jnp.float32)
    x = x.at[:B, :num_inputs].set(states)
    x = x.at[:B, num_inputs].set(1.0)

    kernel = functools.partial(_actor_critic_kernel, hidden, w1f.dtype)
    const = lambda b: (0, 0)   # weights: same block every grid step -> stay VMEM-resident

    out = pl.pallas_call(
        kernel,
        out_shape=jax.ShapeDtypeStruct((bp, OUT_W), jnp.float32),
        grid_spec=pltpu.PrefetchScalarGridSpec(
            num_scalar_prefetch=0,
            grid=(bp // tile_b,),
            in_specs=[
                pl.BlockSpec((tile_b, xw), lambda b: (b, 0)),
                pl.BlockSpec(w1f.shape, const),
                pl.BlockSpec(aw2.shape, const),
                pl.BlockSpec(ab2.shape, const),
                pl.BlockSpec(w3p.shape, const),
                pl.BlockSpec(b3p.shape, const),
                pl.BlockSpec(cw2p.shape, const),
                pl.BlockSpec(cb2p.shape, const),
            ],
            out_specs=pl.BlockSpec((tile_b, OUT_W), lambda b: (b, 0)),
        ),
        compiler_params=pltpu.CompilerParams(dimension_semantics=("parallel",)),
    )(x, w1f, aw2, ab2, w3p, b3p, cw2p, cb2p)

    value = out[:B, POLICY_W:POLICY_W + 1]
    policy = out[:B, :num_actions]
    return value, policy


# --------------------------------------------------------------------------------------
# Init / reference
# --------------------------------------------------------------------------------------
def init_params(key, num_inputs, num_actions, hidden_size):
    """PyTorch-Linear-style init: U(-1/sqrt(fan_in), 1/sqrt(fan_in)); W stored (in, out)."""
    def linear(k, fan_in, fan_out):
        kw, kb = jax.random.split(k)
        bound = 1.0 / jnp.sqrt(jnp.float32(fan_in))
        w = jax.random.uniform(kw, (fan_in, fan_out), jnp.float32, -bound, bound)
        b = jax.random.uniform(kb, (1, fan_out), jnp.float32, -bound, bound)
        return w, b

    keys = jax.random.split(key, 5)
    cw1, cb1 = linear(keys[0], num_inputs, hidden_size)   # critic_linear1
    cw2, cb2 = linear(keys[1], hidden_size, 1)            # critic_linear2
    aw1, ab1 = linear(keys[2], num_inputs, 128)           # actor_linear1
    aw2, ab2 = linear(keys[3], 128, hidden_size)          # actor_linear2
    aw3, ab3 = linear(keys[4], hidden_size, num_actions)  # actor_linear3
    return dict(cw1=cw1, cb1=cb1, cw2=cw2, cb2=cb2,
                aw1=aw1, ab1=ab1, aw2=aw2, ab2=ab2, aw3=aw3, ab3=ab3)


def reference_forward(states, p):
    hp = jax.lax.Precision.HIGHEST
    x = states.astype(jnp.float32)
    h = jnp.maximum(jnp.dot(x, p["cw1"], precision=hp) + p["cb1"], 0.0)
    value = jnp.dot(h, p["cw2"], precision=hp) + p["cb2"]
    a = jnp.maximum(jnp.dot(x, p["aw1"], precision=hp) + p["ab1"], 0.0)
    a = jnp.maximum(jnp.dot(a, p["aw2"], precision=hp) + p["ab2"], 0.0)
    policy = jax.nn.softmax(jnp.dot(a, p["aw3"], precision=hp) + p["ab3"], axis=1)
    return value, policy


# --------------------------------------------------------------------------------------
if __name__ == "__main__":
    num_inputs, num_actions, hidden = 32, 8, 256   # hidden_size = 256 as in the spec
    B = 256

    key = jax.random.PRNGKey(0)
    k_state, k_params = jax.random.split(key)
    states = jax.random.normal(k_state, (B, num_inputs), dtype=jnp.float32)
    params = init_params(k_params, num_inputs, num_actions, hidden)
    v_ref, p_ref = reference_forward(states, params)

    # ----- f32 MXU path (numerically matches the PyTorch module); params packed ONCE -----
    packed = pack_params(params, num_inputs, num_actions, hidden, mxu_dtype=jnp.float32)
    value, policy = actor_critic_forward(states, packed, num_actions=num_actions)
    jax.block_until_ready((value, policy))

    assert value.shape == (B, 1) and policy.shape == (B, num_actions)
    assert jnp.allclose(value, v_ref, atol=5e-3, rtol=5e-3), "critic value mismatch"
    assert jnp.allclose(policy, p_ref, atol=2e-3), "policy mismatch"
    assert jnp.allclose(jnp.sum(policy, axis=1), 1.0, atol=1e-3), "softmax not normalized"

    # ----- single-state path (torch forward does .unsqueeze(0)) -> dedicated 8-row tile -----
    v1, p1 = actor_critic_forward(states[:1], packed, num_actions=num_actions)
    jax.block_until_ready((v1, p1))
    assert v1.shape == (1, 1) and p1.shape == (1, num_actions)
    assert jnp.allclose(v1, v_ref[:1], atol=5e-3, rtol=5e-3)
    assert jnp.allclose(p1, p_ref[:1], atol=2e-3)

    # ----- bf16 MXU inputs with f32 accumulation (recommended on v6e/v7x), loose checks -----
    packed_bf16 = pack_params(params, num_inputs, num_actions, hidden, mxu_dtype=jnp.bfloat16)
    vb, pb = actor_critic_forward(states, packed_bf16, num_actions=num_actions)
    jax.block_until_ready((vb, pb))
    assert jnp.allclose(jnp.sum(pb, axis=1), 1.0, atol=1e-3), "bf16 softmax not normalized"
    assert jnp.allclose(pb, p_ref, atol=5e-2), "bf16 policy mismatch"
    assert jnp.allclose(vb, v_ref, atol=1e-1), "bf16 value mismatch"

    print("KERNEL_OK")
</pallas_src>

<mosaic_0001>
module attributes {stable_mosaic.version = 11 : i64} {
  func.func @_actor_critic_kernel(%arg0: i32, %arg1: memref<256x128xf32, #tpu.memory_space<vmem>>, %arg2: memref<128x384xf32, #tpu.memory_space<vmem>>, %arg3: memref<128x256xf32, #tpu.memory_space<vmem>>, %arg4: memref<1x256xf32, #tpu.memory_space<vmem>>, %arg5: memref<256x128xf32, #tpu.memory_space<vmem>>, %arg6: memref<1x128xf32, #tpu.memory_space<vmem>>, %arg7: memref<256x128xf32, #tpu.memory_space<vmem>>, %arg8: memref<1x128xf32, #tpu.memory_space<vmem>>, %arg9: memref<256x256xf32, #tpu.memory_space<vmem>>) attributes {dimension_semantics = [#tpu.dimension_semantics<parallel>], iteration_bounds = array<i64: 1>, scalar_prefetch = 0 : i64, scratch_operands = 0 : i64, tpu.core_type = #tpu.core_type<tc>, window_params = [{transform_indices = @transform_0, window_bounds = array<i64: 256, 128>}, {pipeline_mode = #tpu.pipeline_mode<synchronous>, transform_indices = @transform_1, window_bounds = array<i64: 128, 384>}, {pipeline_mode = #tpu.pipeline_mode<synchronous>, transform_indices = @transform_2, window_bounds = array<i64: 128, 256>}, {pipeline_mode = #tpu.pipeline_mode<synchronous>, transform_indices = @transform_3, window_bounds = array<i64: 1, 256>}, {pipeline_mode = #tpu.pipeline_mode<synchronous>, transform_indices = @transform_4, window_bounds = array<i64: 256, 128>}, {pipeline_mode = #tpu.pipeline_mode<synchronous>, transform_indices = @transform_5, window_bounds = array<i64: 1, 128>}, {pipeline_mode = #tpu.pipeline_mode<synchronous>, transform_indices = @transform_6, window_bounds = array<i64: 256, 128>}, {pipeline_mode = #tpu.pipeline_mode<synchronous>, transform_indices = @transform_7, window_bounds = array<i64: 1, 128>}, {transform_indices = @transform_8, window_bounds = array<i64: 256, 256>}]} {
    %c0 = arith.constant 0 : index
    %c0_0 = arith.constant 0 : index
    %0 = vector.load %arg1[%c0, %c0_0] : memref<256x128xf32, #tpu.memory_space<vmem>>, vector<256x128xf32>
    %c0_1 = arith.constant 0 : index
    %c0_2 = arith.constant 0 : index
    %1 = vector.load %arg2[%c0_1, %c0_2] : memref<128x384xf32, #tpu.memory_space<vmem>>, vector<128x384xf32>
    %cst = arith.constant dense<0.000000e+00> : vector<256x384xf32>
    %2 = tpu.matmul %0, %1, %cst {dimension_numbers = #tpu.dot_dimension_numbers<[1], [0], [0], [1], [0, 0, 1, 1], [], []>} : vector<256x128xf32>, vector<128x384xf32>, vector<256x384xf32> -> vector<256x384xf32>
    %cst_3 = arith.constant 0.000000e+00 : f32
    %3 = vector.broadcast %cst_3 : f32 to vector<256x384xf32>
    %4 = arith.maximumf %2, %3 : vector<256x384xf32>
    %5 = vector.extract_strided_slice %4 {offsets = [0, 0], sizes = [256, 256], strides = [1, 1]} : vector<256x384xf32> to vector<256x256xf32>
    %6 = vector.extract_strided_slice %4 {offsets = [0, 256], sizes = [256, 128], strides = [1, 1]} : vector<256x384xf32> to vector<256x128xf32>
    %c0_4 = arith.constant 0 : index
    %c0_5 = arith.constant 0 : index
    %7 = vector.load %arg3[%c0_4, %c0_5] : memref<128x256xf32, #tpu.memory_space<vmem>>, vector<128x256xf32>
    %cst_6 = arith.constant dense<0.000000e+00> : vector<256x256xf32>
    %8 = tpu.matmul %6, %7, %cst_6 {dimension_numbers = #tpu.dot_dimension_numbers<[1], [0], [0], [1], [0, 0, 1, 1], [], []>} : vector<256x128xf32>, vector<128x256xf32>, vector<256x256xf32> -> vector<256x256xf32>
    %c0_7 = arith.constant 0 : index
    %c0_8 = arith.constant 0 : index
    %9 = vector.load %arg4[%c0_7, %c0_8] : memref<1x256xf32, #tpu.memory_space<vmem>>, vector<1x256xf32>
    %10 = vector.broadcast %9 : vector<1x256xf32> to vector<256x256xf32>
    %11 = arith.addf %8, %10 : vector<256x256xf32>
    %cst_9 = arith.constant 0.000000e+00 : f32
    %12 = vector.broadcast %cst_9 : f32 to vector<256x256xf32>
    %13 = arith.maximumf %11, %12 : vector<256x256xf32>
    %c0_10 = arith.constant 0 : index
    %c0_11 = arith.constant 0 : index
    %14 = vector.load %arg5[%c0_10, %c0_11] : memref<256x128xf32, #tpu.memory_space<vmem>>, vector<256x128xf32>
    %cst_12 = arith.constant dense<0.000000e+00> : vector<256x128xf32>
    %15 = tpu.matmul %13, %14, %cst_12 {dimension_numbers = #tpu.dot_dimension_numbers<[1], [0], [0], [1], [0, 0, 1, 1], [], []>} : vector<256x256xf32>, vector<256x128xf32>, vector<256x128xf32> -> vector<256x128xf32>
    %c0_13 = arith.constant 0 : index
    %c0_14 = arith.constant 0 : index
    %16 = vector.load %arg6[%c0_13, %c0_14] : memref<1x128xf32, #tpu.memory_space<vmem>>, vector<1x128xf32>
    %17 = vector.broadcast %16 : vector<1x128xf32> to vector<256x128xf32>
    %18 = arith.addf %15, %17 : vector<256x128xf32>
    %c0_15 = arith.constant 0 : index
    %c0_16 = arith.constant 0 : index
    %19 = vector.load %arg7[%c0_15, %c0_16] : memref<256x128xf32, #tpu.memory_space<vmem>>, vector<256x128xf32>
    %cst_17 = arith.constant dense<0.000000e+00> : vector<256x128xf32>
    %20 = tpu.matmul %5, %19, %cst_17 {dimension_numbers = #tpu.dot_dimension_numbers<[1], [0], [0], [1], [0, 0, 1, 1], [], []>} : vector<256x256xf32>, vector<256x128xf32>, vector<256x128xf32> -> vector<256x128xf32>
    %c0_18 = arith.constant 0 : index
    %c0_19 = arith.constant 0 : index
    %21 = vector.load %arg8[%c0_18, %c0_19] : memref<1x128xf32, #tpu.memory_space<vmem>>, vector<1x128xf32>
    %22 = vector.broadcast %21 : vector<1x128xf32> to vector<256x128xf32>
    %23 = arith.addf %20, %22 : vector<256x128xf32>
    %cst_20 = arith.constant dense<0xFF800000> : vector<256xf32>
    %24 = vector.multi_reduction <maximumf>, %18, %cst_20 [1] : vector<256x128xf32> to vector<256xf32>
    %25 = vector.shape_cast %24 : vector<256xf32> to vector<256x1xf32>
    %26 = vector.broadcast %25 : vector<256x1xf32> to vector<256x128xf32>
    %27 = arith.subf %18, %26 : vector<256x128xf32>
    %28 = math.exp %27 : vector<256x128xf32>
    %cst_21 = arith.constant dense<0.000000e+00> : vector<256xf32>
    %29 = vector.multi_reduction <add>, %28, %cst_21 [1] : vector<256x128xf32> to vector<256xf32>
    %30 = vector.shape_cast %29 : vector<256xf32> to vector<256x1xf32>
    %31 = vector.broadcast %30 : vector<256x1xf32> to vector<256x128xf32>
    %32 = arith.divf %28, %31 : vector<256x128xf32>
    %c0_22 = arith.constant 0 : index
    %c0_23 = arith.constant 0 : index
    %33 = vector.load %arg9[%c0_22, %c0_23] : memref<256x256xf32, #tpu.memory_space<vmem>>, vector<256x128xf32>
    tpu.vector_store %arg9[%c0_22, %c0_23], %32 {strides = array<i32>} : memref<256x256xf32, #tpu.memory_space<vmem>>, vector<256x128xf32>,
    %c0_24 = arith.constant 0 : index
    %c128 = arith.constant 128 : index
    %34 = vector.load %arg9[%c0_24, %c128] : memref<256x256xf32, #tpu.memory_space<vmem>>, vector<256x128xf32>
    tpu.vector_store %arg9[%c0_24, %c128], %23 {strides = array<i32>} : memref<256x256xf32, #tpu.memory_space<vmem>>, vector<256x128xf32>,
    return
  }
  func.func @transform_0(%arg0: i32) -> (i32, i32) {
    %c0_i32 = arith.constant 0 : i32
    %c0_i32_0 = arith.constant 0 : i32
    return %arg0, %c0_i32 : i32, i32
  }
  func.func @transform_1(%arg0: i32) -> (i32, i32) {
    %c0_i32 = arith.constant 0 : i32
    %c0_i32_0 = arith.constant 0 : i32
    %c0_i32_1 = arith.constant 0 : i32
    return %c0_i32, %c0_i32_0 : i32, i32
  }
  func.func @transform_2(%arg0: i32) -> (i32, i32) {
    %c0_i32 = arith.constant 0 : i32
    %c0_i32_0 = arith.constant 0 : i32
    %c0_i32_1 = arith.constant 0 : i32
    return %c0_i32, %c0_i32_0 : i32, i32
  }
  func.func @transform_3(%arg0: i32) -> (i32, i32) {
    %c0_i32 = arith.constant 0 : i32
    %c0_i32_0 = arith.constant 0 : i32
    %c0_i32_1 = arith.constant 0 : i32
    return %c0_i32, %c0_i32_0 : i32, i32
  }
  func.func @transform_4(%arg0: i32) -> (i32, i32) {
    %c0_i32 = arith.constant 0 : i32
    %c0_i32_0 = arith.constant 0 : i32
    %c0_i32_1 = arith.constant 0 : i32
    return %c0_i32, %c0_i32_0 : i32, i32
  }
  func.func @transform_5(%arg0: i32) -> (i32, i32) {
    %c0_i32 = arith.constant 0 : i32
    %c0_i32_0 = arith.constant 0 : i32
    %c0_i32_1 = arith.constant 0 : i32
    return %c0_i32, %c0_i32_0 : i32, i32
  }
  func.func @transform_6(%arg0: i32) -> (i32, i32) {
    %c0_i32 = arith.constant 0 : i32
    %c0_i32_0 = arith.constant 0 : i32
    %c0_i32_1 = arith.constant 0 : i32
    return %c0_i32, %c0_i32_0 : i32, i32
  }
  func.func @transform_7(%arg0: i32) -> (i32, i32) {
    %c0_i32 = arith.constant 0 : i32
    %c0_i32_0 = arith.constant 0 : i32
    %c0_i32_1 = arith.constant 0 : i32
    return %c0_i32, %c0_i32_0 : i32, i32
  }
  func.func @transform_8(%arg0: i32) -> (i32, i32) {
    %c0_i32 = arith.constant 0 : i32
    %c0_i32_0 = arith.constant 0 : i32
    return %arg0, %c0_i32 : i32, i32
  }
}

</mosaic_0001>

<bundles_post_ra>
// kernel: actor_critic_forward.1
= control target key start
LH: loop header
LB: loop body
LE: loop exit
PB: predicated region body
PF: predicated region fallthrough
CT: control target
= control target key end

     0   :  { %s3890_s1 = inlined_call_operand.vmem [shape: f32[128,384], index: 1, kind: input, shape index: {}]   ;;  %s3891_s0 = inlined_call_operand.vmem [shape: f32[256,128], index: 0, kind: input, shape index: {}]   ;;  %s3892_s2 = inlined_call_operand.vmem [shape: f32[128,256], index: 2, kind: input, shape index: {}]   ;;  %s3893_s4 = inlined_call_operand.vmem [shape: f32[256,128], index: 4, kind: input, shape index: {}]   ;;  %s3894_s6 = inlined_call_operand.vmem [shape: f32[256,128], index: 6, kind: input, shape index: {}]   ;;  %s3895_s3 = inlined_call_operand.vmem [shape: f32[1,256], index: 3, kind: input, shape index: {}]   ;;  %s3896_s7 = inlined_call_operand.vmem [shape: f32[1,128], index: 7, kind: input, shape index: {}]   ;;  %s3897_s8 = inlined_call_operand.vmem [shape: f32[256,256], index: 8, kind: output, shape index: {}]   ;;  %s3898_s5 = inlined_call_operand.vmem [shape: f32[1,128], index: 5, kind: input, shape index: {}]  }
   0x1   :  { %v108_v0 = vld [vmem:[%s3890_s1 + $0x178] sm:$0xff]  ;;  %v105_v1 = vld [vmem:[%s3890_s1 + $0x160] sm:$0xff]  ;;  %v102_v2 = vld [vmem:[%s3890_s1 + $0x148] sm:$0xff] }
   0x2   :  { %1986 = vmatprep.subr.mxu1 %v108_v0  ;;  %v99_v3 = vld [vmem:[%s3890_s1 + $0x130] sm:$0xff]  ;;  %v2320_v4 = vld [vmem:[%s3891_s0] sm:$0xff]  ;;  %v96_v5 = vld [vmem:[%s3890_s1 + $0x118] sm:$0xff] }
   0x3   :  { %1987 = vmatpush3.msra.mxu1 %v108_v0  ;;  %2018 = vmatprep.mubr.f32.mxu1 %v2320_v4  ;;  %v93_v6 = vld [vmem:[%s3890_s1 + $0x100] sm:$0xff]  ;;  %v90_v7 = vld [vmem:[%s3890_s1 + $0xe8] sm:$0xff]  ;;  %v87_v8 = vld [vmem:[%s3890_s1 + $0xd0] sm:$0xff] }
   0x4   :  { %1988 = vmatprep.subr.mxu1 %v105_v1  ;;  %v84_v9 = vld [vmem:[%s3890_s1 + $0xb8] sm:$0xff]  ;;  %v81_v10 = vld [vmem:[%s3890_s1 + $0xa0] sm:$0xff]  ;;  %v78_v11 = vld [vmem:[%s3890_s1 + $0x88] sm:$0xff] }
   0x5   :  { %1989 = vmatpush3.msra.mxu1 %v105_v1  ;;  %v75_v12 = vld [vmem:[%s3890_s1 + $0x70] sm:$0xff]  ;;  %v72_v13 = vld [vmem:[%s3890_s1 + $0x58] sm:$0xff]  ;;  %v69_v14 = vld [vmem:[%s3890_s1 + $0x40] sm:$0xff] }
   0x6   :  { %1990 = vmatprep.subr.mxu1 %v102_v2  ;;  %v66_v15 = vld [vmem:[%s3890_s1 + $0x28] sm:$0xff]  ;;  %v63_v16 = vld [vmem:[%s3890_s1 + $0x10] sm:$0xff]  ;;  %v718_v18 = vld [vmem:[%s3892_s2 + $0xf8] sm:$0xff] }
   0x7   :  { %1991 = vmatpush3.msra.mxu1 %v102_v2  ;;  %v2362_v17 = vld [vmem:[%s3891_s0 + $0x8] sm:$0xff]  ;;  %v2370_v19 = vld [vmem:[%s3891_s0 + $0x10] sm:$0xff]  ;;  %v715_v22 = vld [vmem:[%s3892_s2 + $0xe0] sm:$0xff] }
   0x8   :  { %1992 = vmatprep.subr.mxu1 %v99_v3  ;;  %v717_v20 = vld [vmem:[%s3892_s2 + $0xf0] sm:$0xff]  ;;  %v716_v21 = vld [vmem:[%s3892_s2 + $0xe8] sm:$0xff]  ;;  %v2386_v23 = vld [vmem:[%s3891_s0 + $0x18] sm:$0xff] }
   0x9   :  { %1993 = vmatpush3.msra.mxu1 %v99_v3  ;;  %v714_v24 = vld [vmem:[%s3892_s2 + $0xd8] sm:$0xff]  ;;  %v2394_v25 = vld [vmem:[%s3891_s0 + $0x20] sm:$0xff]  ;;  %v713_v26 = vld [vmem:[%s3892_s2 + $0xd0] sm:$0xff] }
   0xa   :  { %1994 = vmatprep.subr.mxu1 %v96_v5  ;;  %v712_v27 = vld [vmem:[%s3892_s2 + $0xc8] sm:$0xff]  ;;  %v711_v28 = vld [vmem:[%s3892_s2 + $0xc0] sm:$0xff]  ;;  %v710_v30 = vld [vmem:[%s3892_s2 + $0xb8] sm:$0xff] }
   0xb   :  { %1995 = vmatpush3.msra.mxu1 %v96_v5  ;;  %v2410_v29 = vld [vmem:[%s3891_s0 + $0x28] sm:$0xff]  ;;  %v2418_v31 = vld [vmem:[%s3891_s0 + $0x30] sm:$0xff]  ;;  %v707_v34 = vld [vmem:[%s3892_s2 + $0xa0] sm:$0xff] }
   0xc   :  { %1996 = vmatprep.subr.mxu1 %v93_v6  ;;  %v709_v32 = vld [vmem:[%s3892_s2 + $0xb0] sm:$0xff]  ;;  %v708_v33 = vld [vmem:[%s3892_s2 + $0xa8] sm:$0xff]  ;;  %v2434_v35 = vld [vmem:[%s3891_s0 + $0x38] sm:$0xff] }
   0xd   :  { %1997 = vmatpush3.msra.mxu1 %v93_v6  ;;  %v706_v36 = vld [vmem:[%s3892_s2 + $0x98] sm:$0xff]  ;;  %v2442_v37 = vld [vmem:[%s3891_s0 + $0x40] sm:$0xff]  ;;  %v705_v38 = vld [vmem:[%s3892_s2 + $0x90] sm:$0xff] }
   0xe   :  { %1998 = vmatprep.subr.mxu1 %v90_v7  ;;  %v704_v39 = vld [vmem:[%s3892_s2 + $0x88] sm:$0xff]  ;;  %v703_v40 = vld [vmem:[%s3892_s2 + $0x80] sm:$0xff]  ;;  %v702_v42 = vld [vmem:[%s3892_s2 + $0x78] sm:$0xff] }
   0xf   :  { %1999 = vmatpush3.msra.mxu1 %v90_v7  ;;  %v2458_v41 = vld [vmem:[%s3891_s0 + $0x48] sm:$0xff]  ;;  %v2466_v43 = vld [vmem:[%s3891_s0 + $0x50] sm:$0xff]  ;;  %v699_v46 = vld [vmem:[%s3892_s2 + $0x60] sm:$0xff] }
  0x10   :  { %2000 = vmatprep.subr.mxu1 %v87_v8  ;;  %v701_v44 = vld [vmem:[%s3892_s2 + $0x70] sm:$0xff]  ;;  %v700_v45 = vld [vmem:[%s3892_s2 + $0x68] sm:$0xff]  ;;  %v2482_v47 = vld [vmem:[%s3891_s0 + $0x58] sm:$0xff] }
  0x11   :  { %2001 = vmatpush3.msra.mxu1 %v87_v8  ;;  %v698_v48 = vld [vmem:[%s3892_s2 + $0x58] sm:$0xff]  ;;  %v2490_v49 = vld [vmem:[%s3891_s0 + $0x60] sm:$0xff]  ;;  %v697_v50 = vld [vmem:[%s3892_s2 + $0x50] sm:$0xff] }
  0x12   :  { %2002 = vmatprep.subr.mxu1 %v84_v9  ;;  %v696_v51 = vld [vmem:[%s3892_s2 + $0x48] sm:$0xff]  ;;  %v695_v52 = vld [vmem:[%s3892_s2 + $0x40] sm:$0xff]  ;;  %v694_v54 = vld [vmem:[%s3892_s2 + $0x38] sm:$0xff] }
  0x13   :  { %2003 = vmatpush3.msra.mxu1 %v84_v9  ;;  %v2506_v53 = vld [vmem:[%s3891_s0 + $0x68] sm:$0xff]  ;;  %v2514_v55 = vld [vmem:[%s3891_s0 + $0x70] sm:$0xff]  ;;  %v691_v58 = vld [vmem:[%s3892_s2 + $0x20] sm:$0xff] }
  0x14   :  { %2004 = vmatprep.subr.mxu1 %v81_v10  ;;  %v693_v56 = vld [vmem:[%s3892_s2 + $0x30] sm:$0xff]  ;;  %v692_v57 = vld [vmem:[%s3892_s2 + $0x28] sm:$0xff]  ;;  %v2530_v59 = vld [vmem:[%s3891_s0 + $0x78] sm:$0xff] }
  0x15   :  { %2005 = vmatpush3.msra.mxu1 %v81_v10  ;;  %v690_v60 = vld [vmem:[%s3892_s2 + $0x18] sm:$0xff]  ;;  %v2538_v61 = vld [vmem:[%s3891_s0 + $0x80] sm:$0xff]  ;;  %v689_v62 = vld [vmem:[%s3892_s2 + $0x10] sm:$0xff] }
  0x16   :  { %2006 = vmatprep.subr.mxu1 %v78_v11  ;;  %v2548_v63 = vld [vmem:[%s3891_s0 + $0x88] sm:$0xff]  ;;  %v2553_v0 = vld [vmem:[%s3891_s0 + $0x90] sm:$0xff]  ;;  %v2560_v1 = vld [vmem:[%s3891_s0 + $0x98] sm:$0xff] }
  0x17   :  { %2007 = vmatpush3.msra.mxu1 %v78_v11  ;;  %v2565_v2 = vld [vmem:[%s3891_s0 + $0xa0] sm:$0xff]  ;;  %v2572_v3 = vld [vmem:[%s3891_s0 + $0xa8] sm:$0xff]  ;;  %v2577_v5 = vld [vmem:[%s3891_s0 + $0xb0] sm:$0xff] }
  0x18   :  { %2008 = vmatprep.subr.mxu1 %v75_v12  ;;  %v2584_v6 = vld [vmem:[%s3891_s0 + $0xb8] sm:$0xff]  ;;  %v2589_v7 = vld [vmem:[%s3891_s0 + $0xc0] sm:$0xff]  ;;  %v2596_v8 = vld [vmem:[%s3891_s0 + $0xc8] sm:$0xff] }
  0x19   :  { %2009 = vmatpush3.msra.mxu1 %v75_v12  ;;  %v2601_v9 = vld [vmem:[%s3891_s0 + $0xd0] sm:$0xff]  ;;  %v2608_v10 = vld [vmem:[%s3891_s0 + $0xd8] sm:$0xff]  ;;  %v2613_v11 = vld [vmem:[%s3891_s0 + $0xe0] sm:$0xff] }
  0x1a   :  { %2010 = vmatprep.subr.mxu1 %v72_v13  ;;  %v2620_v12 = vld [vmem:[%s3891_s0 + $0xe8] sm:$0xff] }
  0x1b   :  { %2011 = vmatpush3.msra.mxu1 %v72_v13  ;;  %v2625_v13 = vld [vmem:[%s3891_s0 + $0xf0] sm:$0xff] }
  0x1c   :  { %2012 = vmatprep.subr.mxu1 %v69_v14 }
  0x1d   :  { %2013 = vmatpush3.msra.mxu1 %v69_v14  ;;  %v2632_v14 = vld [vmem:[%s3891_s0 + $0xf8] sm:$0xff] }
  0x1e   :  { %2014 = vmatprep.subr.mxu1 %v66_v15 }
  0x1f   :  { %2015 = vmatpush3.msra.mxu1 %v66_v15  ;;  %v688_v15 = vld [vmem:[%s3892_s2 + $0x8] sm:$0xff] }
  0x20   :  { %2016 = vmatprep.subr.mxu1 %v63_v16 }
  0x21   :  { %2017 = vmatpush3.msra.mxu1 %v63_v16  ;;  %v687_v16 = vld [vmem:[%s3892_s2] sm:$0xff] }
  0x22   :  { %2019 = vmatmul.mubr.f32.vlgmr.msra.gmra.mxu1 %v2362_v17  ;;  %731 = vmatprep.subr.mxu1 %v718_v18  ;;  %v3899_v18 = vmov 0.0  }
  0x23   :  { %2021 = vmatprep.mubr.f32.mxu1 %v2370_v19  ;;  %732 = vmatpush1.msra.mxu1 %v717_v20  ;;  %v107_v20 = vld [vmem:[%s3890_s1 + $0x170] sm:$0xff] }
  0x24   :  { %733 = vmatprep.subr.mxu1 %v716_v21  ;;  %173 = vmatprep.mubr.f32.mxu0 %v3899_v18  ;;  %v106_v21 = vld [vmem:[%s3890_s1 + $0x168] sm:$0xff] }
  0x25   :  { %734 = vmatpush1.msra.mxu1 %v715_v22  ;;  %109 = vmatprep.subr.mxu0 %v107_v20  ;;  %v104_v22 = vld [vmem:[%s3890_s1 + $0x158] sm:$0xff]  ;;  %v61_v20 = vld [vmem:[%s3890_s1] sm:$0xff] }
  0x26   :  { %2022 = vmatmul.mubr.f32.gmra.mxu1 %v2386_v23  ;;  %735 = vmatprep.subr.mxu1 %v714_v24  ;;  %v103_v24 = vld [vmem:[%s3890_s1 + $0x150] sm:$0xff] }
  0x27   :  { %2024 = vmatprep.mubr.f32.mxu1 %v2394_v25  ;;  %736 = vmatpush1.msra.mxu1 %v713_v26  ;;  %v101_v26 = vld [vmem:[%s3890_s1 + $0x140] sm:$0xff] }
  0x28   :  { %737 = vmatprep.subr.mxu1 %v712_v27  ;;  %110 = vmatpush1.msra.mxu0 %v106_v21  ;;  %v100_v27 = vld [vmem:[%s3890_s1 + $0x138] sm:$0xff] }
  0x29   :  { %738 = vmatpush1.msra.mxu1 %v711_v28  ;;  %111 = vmatprep.subr.mxu0 %v104_v22  ;;  %v98_v28 = vld [vmem:[%s3890_s1 + $0x128] sm:$0xff]  ;;  %v1067_v21 = vld [vmem:[%s3893_s4 + $0x78] sm:$0xff]  ;;  %v1054_v22 = vld [vmem:[%s3893_s4 + $0x10] sm:$0xff] }
  0x2a   :  { %2025 = vmatmul.mubr.f32.gmra.mxu1 %v2410_v29  ;;  %739 = vmatprep.subr.mxu1 %v710_v30  ;;  %v97_v30 = vld [vmem:[%s3890_s1 + $0x120] sm:$0xff] }
  0x2b   :  { %2027 = vmatprep.mubr.f32.mxu1 %v2418_v31  ;;  %740 = vmatpush1.msra.mxu1 %v709_v32  ;;  %v95_v32 = vld [vmem:[%s3890_s1 + $0x110] sm:$0xff] }
  0x2c   :  { %741 = vmatprep.subr.mxu1 %v708_v33  ;;  %112 = vmatpush1.msra.mxu0 %v103_v24  ;;  %v94_v33 = vld [vmem:[%s3890_s1 + $0x108] sm:$0xff] }
  0x2d   :  { %742 = vmatpush1.msra.mxu1 %v707_v34  ;;  %113 = vmatprep.subr.mxu0 %v101_v26  ;;  %v92_v34 = vld [vmem:[%s3890_s1 + $0xf8] sm:$0xff] }
  0x2e   :  { %2028 = vmatmul.mubr.f32.gmra.mxu1 %v2434_v35  ;;  %743 = vmatprep.subr.mxu1 %v706_v36  ;;  %v91_v36 = vld [vmem:[%s3890_s1 + $0xf0] sm:$0xff] }
  0x2f   :  { %2030 = vmatprep.mubr.f32.mxu1 %v2442_v37  ;;  %744 = vmatpush1.msra.mxu1 %v705_v38  ;;  %v89_v38 = vld [vmem:[%s3890_s1 + $0xe0] sm:$0xff] }
  0x30   :  { %745 = vmatprep.subr.mxu1 %v704_v39  ;;  %114 = vmatpush1.msra.mxu0 %v100_v27  ;;  %v88_v39 = vld [vmem:[%s3890_s1 + $0xd8] sm:$0xff] }
  0x31   :  { %746 = vmatpush1.msra.mxu1 %v703_v40  ;;  %115 = vmatprep.subr.mxu0 %v98_v28  ;;  %v86_v40 = vld [vmem:[%s3890_s1 + $0xc8] sm:$0xff] }
  0x32   :  { %2031 = vmatmul.mubr.f32.gmra.mxu1 %v2458_v41  ;;  %747 = vmatprep.subr.mxu1 %v702_v42  ;;  %v85_v42 = vld [vmem:[%s3890_s1 + $0xc0] sm:$0xff] }
  0x33   :  { %2033 = vmatprep.mubr.f32.mxu1 %v2466_v43  ;;  %748 = vmatpush1.msra.mxu1 %v701_v44  ;;  %v83_v44 = vld [vmem:[%s3890_s1 + $0xb0] sm:$0xff] }
  0x34   :  { %749 = vmatprep.subr.mxu1 %v700_v45  ;;  %116 = vmatpush1.msra.mxu0 %v97_v30  ;;  %v82_v45 = vld [vmem:[%s3890_s1 + $0xa8] sm:$0xff] }
  0x35   :  { %750 = vmatpush1.msra.mxu1 %v699_v46  ;;  %117 = vmatprep.subr.mxu0 %v95_v32  ;;  %v80_v46 = vld [vmem:[%s3890_s1 + $0x98] sm:$0xff] }
  0x36   :  { %2034 = vmatmul.mubr.f32.gmra.mxu1 %v2482_v47  ;;  %751 = vmatprep.subr.mxu1 %v698_v48  ;;  %v79_v48 = vld [vmem:[%s3890_s1 + $0x90] sm:$0xff] }
  0x37   :  { %2036 = vmatprep.mubr.f32.mxu1 %v2490_v49  ;;  %752 = vmatpush1.msra.mxu1 %v697_v50  ;;  %v77_v50 = vld [vmem:[%s3890_s1 + $0x80] sm:$0xff] }
  0x38   :  { %753 = vmatprep.subr.mxu1 %v696_v51  ;;  %118 = vmatpush1.msra.mxu0 %v94_v33  ;;  %v76_v51 = vld [vmem:[%s3890_s1 + $0x78] sm:$0xff] }
  0x39   :  { %754 = vmatpush1.msra.mxu1 %v695_v52  ;;  %119 = vmatprep.subr.mxu0 %v92_v34  ;;  %v74_v52 = vld [vmem:[%s3890_s1 + $0x68] sm:$0xff] }
  0x3a   :  { %2037 = vmatmul.mubr.f32.gmra.mxu1 %v2506_v53  ;;  %755 = vmatprep.subr.mxu1 %v694_v54  ;;  %v73_v54 = vld [vmem:[%s3890_s1 + $0x60] sm:$0xff] }
  0x3b   :  { %2039 = vmatprep.mubr.f32.mxu1 %v2514_v55  ;;  %756 = vmatpush1.msra.mxu1 %v693_v56  ;;  %v71_v56 = vld [vmem:[%s3890_s1 + $0x50] sm:$0xff] }
  0x3c   :  { %757 = vmatprep.subr.mxu1 %v692_v57  ;;  %120 = vmatpush1.msra.mxu0 %v91_v36  ;;  %v70_v57 = vld [vmem:[%s3890_s1 + $0x48] sm:$0xff] }
  0x3d   :  { %758 = vmatpush1.msra.mxu1 %v691_v58  ;;  %121 = vmatprep.subr.mxu0 %v89_v38  ;;  %v68_v58 = vld [vmem:[%s3890_s1 + $0x38] sm:$0xff] }
  0x3e   :  { %2040 = vmatmul.mubr.f32.gmra.mxu1 %v2530_v59  ;;  %759 = vmatprep.subr.mxu1 %v690_v60  ;;  %v67_v60 = vld [vmem:[%s3890_s1 + $0x30] sm:$0xff] }
  0x3f   :  { %2042 = vmatprep.mubr.f32.mxu1 %v2538_v61  ;;  %760 = vmatpush1.msra.mxu1 %v689_v62  ;;  %v65_v62 = vld [vmem:[%s3890_s1 + $0x20] sm:$0xff] }
  0x40   :  { %761 = vmatprep.subr.mxu1 %v688_v15  ;;  %122 = vmatpush1.msra.mxu0 %v88_v39  ;;  %v64_v15 = vld [vmem:[%s3890_s1 + $0x18] sm:$0xff] }
  0x41   :  { %762 = vmatpush1.msra.mxu1 %v687_v16  ;;  %123 = vmatprep.subr.mxu0 %v86_v40  ;;  %v62_v16 = vld [vmem:[%s3890_s1 + $0x8] sm:$0xff] }
  0x42   :  { %2043 = vmatmul.mubr.f32.gmra.mxu1 %v2548_v63  ;;  %2066 = vmatprep.subr.mxu1 %v3899_v18 }
  0x43   :  { %2045 = vmatprep.mubr.f32.mxu1 %v2553_v0  ;;  %124 = vmatpush1.msra.mxu0 %v85_v42 }
  0x44   :  { %125 = vmatprep.subr.mxu0 %v83_v44 }
  0x45   :  { %126 = vmatpush1.msra.mxu0 %v82_v45 }
  0x46   :  { %2046 = vmatmul.mubr.f32.gmra.mxu1 %v2560_v1  ;;  %127 = vmatprep.subr.mxu0 %v80_v46 }
  0x47   :  { %2048 = vmatprep.mubr.f32.mxu1 %v2565_v2  ;;  %128 = vmatpush1.msra.mxu0 %v79_v48 }
  0x48   :  { %129 = vmatprep.subr.mxu0 %v77_v50 }
  0x49   :  { %130 = vmatpush1.msra.mxu0 %v76_v51 }
  0x4a   :  { %2049 = vmatmul.mubr.f32.gmra.mxu1 %v2572_v3  ;;  %131 = vmatprep.subr.mxu0 %v74_v52 }
  0x4b   :  { %2051 = vmatprep.mubr.f32.mxu1 %v2577_v5  ;;  %132 = vmatpush1.msra.mxu0 %v73_v54 }
  0x4c   :  { %133 = vmatprep.subr.mxu0 %v71_v56 }
  0x4d   :  { %134 = vmatpush1.msra.mxu0 %v70_v57 }
  0x4e   :  { %2052 = vmatmul.mubr.f32.gmra.mxu1 %v2584_v6  ;;  %135 = vmatprep.subr.mxu0 %v68_v58 }
  0x4f   :  { %2054 = vmatprep.mubr.f32.mxu1 %v2589_v7  ;;  %136 = vmatpush1.msra.mxu0 %v67_v60 }
  0x50   :  { %137 = vmatprep.subr.mxu0 %v65_v62 }
  0x51   :  { %138 = vmatpush1.msra.mxu0 %v64_v15 }
  0x52   :  { %2055 = vmatmul.mubr.f32.gmra.mxu1 %v2596_v8  ;;  %139 = vmatprep.subr.mxu0 %v62_v16 }
  0x53   :  { %2057 = vmatprep.mubr.f32.mxu1 %v2601_v9  ;;  %140 = vmatpush1.msra.mxu0 %v61_v20 }
  0x54   :  { %174 = vmatmul.mubr.f32.vlgmr.msra.gmra.mxu0 %v2320_v4  ;;  %1091 = vmatprep.subr.mxu0 %v3899_v18  ;;  %v1066_v4 = vld [vmem:[%s3893_s4 + $0x70] sm:$0xff] }
  0x55   :  { %179 = vmatprep.mubr.f32.mxu0 %v3899_v18  ;;  %1092 = vmatpush1.msra.mxu0 %v1067_v21 }
  0x56   :  { %2058 = vmatmul.mubr.f32.gmra.mxu1 %v2608_v10  ;;  %1093 = vmatprep.subr.mxu0 %v3899_v18 }
  0x57   :  { %2060 = vmatprep.mubr.f32.mxu1 %v2613_v11  ;;  %1094 = vmatpush1.msra.mxu0 %v1066_v4 }
  0x58   :  { %180 = vmatmul.mubr.f32.gmra.mxu0 %v2362_v17  ;;  %1095 = vmatprep.subr.mxu0 %v3899_v18  ;;  %v1065_v17 = vld [vmem:[%s3893_s4 + $0x68] sm:$0xff] }
  0x59   :  { %185 = vmatprep.mubr.f32.mxu0 %v3899_v18  ;;  %1096 = vmatpush1.msra.mxu0 %v1065_v17 }
  0x5a   :  { %2061 = vmatmul.mubr.f32.gmra.mxu1 %v2620_v12  ;;  %1097 = vmatprep.subr.mxu0 %v3899_v18 }
  0x5b   :  { %2063 = vmatprep.mubr.f32.mxu1 %v2625_v13 }
  0x5c   :  { %186 = vmatmul.mubr.f32.gmra.mxu0 %v2370_v19  ;;  %v1064_v19 = vld [vmem:[%s3893_s4 + $0x60] sm:$0xff] }
  0x5d   :  { %191 = vmatprep.mubr.f32.mxu0 %v3899_v18  ;;  %1098 = vmatpush1.msra.mxu0 %v1064_v19 }
  0x5e   :  { %2064 = vmatmul.mubr.f32.gmra.mxu1 %v2632_v14  ;;  %1099 = vmatprep.subr.mxu0 %v3899_v18 }
  0x5f   :  { %795 = vmatprep.mubr.f32.mxu1 %v3899_v18 }
  0x60   :  { %192 = vmatmul.mubr.f32.gmra.mxu0 %v2386_v23  ;;  %v1063_v23 = vld [vmem:[%s3893_s4 + $0x58] sm:$0xff] }
  0x61   :  { %197 = vmatprep.mubr.f32.mxu0 %v3899_v18  ;;  %1100 = vmatpush1.msra.mxu0 %v1063_v23 }
  0x62   :  { %1101 = vmatprep.subr.mxu0 %v3899_v18 }
  0x64   :  { %198 = vmatmul.mubr.f32.gmra.mxu0 %v2394_v25  ;;  %v1062_v25 = vld [vmem:[%s3893_s4 + $0x50] sm:$0xff] }
  0x65   :  { %203 = vmatprep.mubr.f32.mxu0 %v3899_v18  ;;  %1102 = vmatpush1.msra.mxu0 %v1062_v25 }
  0x66   :  { %1103 = vmatprep.subr.mxu0 %v3899_v18 }
  0x68   :  { %204 = vmatmul.mubr.f32.gmra.mxu0 %v2410_v29  ;;  %v1061_v29 = vld [vmem:[%s3893_s4 + $0x48] sm:$0xff] }
  0x69   :  { %209 = vmatprep.mubr.f32.mxu0 %v3899_v18  ;;  %1104 = vmatpush1.msra.mxu0 %v1061_v29 }
  0x6a   :  { %1105 = vmatprep.subr.mxu0 %v3899_v18 }
  0x6c   :  { %210 = vmatmul.mubr.f32.gmra.mxu0 %v2418_v31  ;;  %v1060_v31 = vld [vmem:[%s3893_s4 + $0x40] sm:$0xff] }
  0x6d   :  { %215 = vmatprep.mubr.f32.mxu0 %v3899_v18  ;;  %1106 = vmatpush1.msra.mxu0 %v1060_v31 }
  0x6e   :  { %1107 = vmatprep.subr.mxu0 %v3899_v18 }
  0x70   :  { %216 = vmatmul.mubr.f32.gmra.mxu0 %v2434_v35  ;;  %v1059_v35 = vld [vmem:[%s3893_s4 + $0x38] sm:$0xff] }
  0x71   :  { %221 = vmatprep.mubr.f32.mxu0 %v3899_v18  ;;  %1108 = vmatpush1.msra.mxu0 %v1059_v35 }
  0x72   :  { %1109 = vmatprep.subr.mxu0 %v3899_v18 }
  0x74   :  { %222 = vmatmul.mubr.f32.gmra.mxu0 %v2442_v37  ;;  %v1058_v37 = vld [vmem:[%s3893_s4 + $0x30] sm:$0xff] }
  0x75   :  { %227 = vmatprep.mubr.f32.mxu0 %v3899_v18  ;;  %1110 = vmatpush1.msra.mxu0 %v1058_v37 }
  0x76   :  { %1111 = vmatprep.subr.mxu0 %v3899_v18 }
  0x78   :  { %228 = vmatmul.mubr.f32.gmra.mxu0 %v2458_v41  ;;  %v1057_v41 = vld [vmem:[%s3893_s4 + $0x28] sm:$0xff] }
  0x79   :  { %233 = vmatprep.mubr.f32.mxu0 %v3899_v18  ;;  %1112 = vmatpush1.msra.mxu0 %v1057_v41 }
  0x7a   :  { %1113 = vmatprep.subr.mxu0 %v3899_v18 }
  0x7c   :  { %234 = vmatmul.mubr.f32.gmra.mxu0 %v2466_v43  ;;  %v1056_v43 = vld [vmem:[%s3893_s4 + $0x20] sm:$0xff] }
  0x7d   :  { %239 = vmatprep.mubr.f32.mxu0 %v3899_v18  ;;  %1114 = vmatpush1.msra.mxu0 %v1056_v43 }
  0x7e   :  { %1115 = vmatprep.subr.mxu0 %v3899_v18 }
  0x80   :  { %240 = vmatmul.mubr.f32.gmra.mxu0 %v2482_v47  ;;  %v1055_v47 = vld [vmem:[%s3893_s4 + $0x18] sm:$0xff] }
  0x81   :  { %245 = vmatprep.mubr.f32.mxu0 %v3899_v18  ;;  %1116 = vmatpush1.msra.mxu0 %v1055_v47 }
  0x82   :  { %1117 = vmatprep.subr.mxu0 %v3899_v18 }
  0x83   :  { %1118 = vmatpush1.msra.mxu0 %v1054_v22 }
  0x84   :  { %246 = vmatmul.mubr.f32.gmra.mxu0 %v2490_v49  ;;  %1119 = vmatprep.subr.mxu0 %v3899_v18 }
  0x85   :  { %251 = vmatprep.mubr.f32.mxu0 %v3899_v18 }
  0x88   :  { %252 = vmatmul.mubr.f32.gmra.mxu0 %v2506_v53  ;;  %v1053_v53 = vld [vmem:[%s3893_s4 + $0x8] sm:$0xff] }
  0x89   :  { %257 = vmatprep.mubr.f32.mxu0 %v3899_v18  ;;  %1120 = vmatpush1.msra.mxu0 %v1053_v53 }
  0x8a   :  { %1121 = vmatprep.subr.mxu0 %v3899_v18 }
  0x8c   :  { %258 = vmatmul.mubr.f32.gmra.mxu0 %v2514_v55  ;;  %v1052_v55 = vld [vmem:[%s3893_s4] sm:$0xff] }
  0x8d   :  { %263 = vmatprep.mubr.f32.mxu0 %v3899_v18  ;;  %1122 = vmatpush1.msra.mxu0 %v1052_v55 }
  0x8e   :  { %1123 = vmatprep.subr.mxu0 %v3899_v18 }
  0x90   :  { %264 = vmatmul.mubr.f32.gmra.mxu0 %v2530_v59  ;;  %v1083_v59 = vld [vmem:[%s3893_s4 + $0xf8] sm:$0xff] }
  0x91   :  { %269 = vmatprep.mubr.f32.mxu0 %v3899_v18  ;;  %1124 = vmatpush2.msra.mxu0 %v1083_v59 }
  0x92   :  { %1125 = vmatprep.subr.mxu0 %v3899_v18 }
  0x94   :  { %270 = vmatmul.mubr.f32.gmra.mxu0 %v2538_v61  ;;  %v1082_v61 = vld [vmem:[%s3893_s4 + $0xf0] sm:$0xff] }
  0x95   :  { %275 = vmatprep.mubr.f32.mxu0 %v3899_v18  ;;  %1126 = vmatpush2.msra.mxu0 %v1082_v61  ;;  %v2962_v61 = vld [vmem:[%s3894_s6 + $0x78] sm:$0xff] }
  0x96   :  { %1127 = vmatprep.subr.mxu0 %v3899_v18 }
  0x98   :  { %276 = vmatmul.mubr.f32.gmra.mxu0 %v2548_v63  ;;  %v1081_v63 = vld [vmem:[%s3893_s4 + $0xe8] sm:$0xff] }
  0x99   :  { %281 = vmatprep.mubr.f32.mxu0 %v3899_v18  ;;  %1128 = vmatpush2.msra.mxu0 %v1081_v63  ;;  %v2969_v63 = vld [vmem:[%s3894_s6 + $0x70] sm:$0xff] }
  0x9a   :  { %1129 = vmatprep.subr.mxu0 %v3899_v18 }
  0x9c   :  { %282 = vmatmul.mubr.f32.gmra.mxu0 %v2553_v0  ;;  %v1080_v0 = vld [vmem:[%s3893_s4 + $0xe0] sm:$0xff] }
  0x9d   :  { %287 = vmatprep.mubr.f32.mxu0 %v3899_v18  ;;  %1130 = vmatpush2.msra.mxu0 %v1080_v0 }
  0x9e   :  { %1131 = vmatprep.subr.mxu0 %v3899_v18 }
  0xa0   :  { %288 = vmatmul.mubr.f32.gmra.mxu0 %v2560_v1  ;;  %v1079_v1 = vld [vmem:[%s3893_s4 + $0xd8] sm:$0xff] }
  0xa1   :  { %293 = vmatprep.mubr.f32.mxu0 %v3899_v18  ;;  %1132 = vmatpush2.msra.mxu0 %v1079_v1 }
  0xa2   :  { %1133 = vmatprep.subr.mxu0 %v3899_v18 }
  0xa4   :  { %294 = vmatmul.mubr.f32.gmra.mxu0 %v2565_v2  ;;  %v1078_v2 = vld [vmem:[%s3893_s4 + $0xd0] sm:$0xff] }
  0xa5   :  { %299 = vmatprep.mubr.f32.mxu0 %v3899_v18  ;;  %1134 = vmatpush2.msra.mxu0 %v1078_v2  ;;  %v3006_v2 = vld [vmem:[%s3894_s6 + $0x48] sm:$0xff] }
  0xa6   :  { %1135 = vmatprep.subr.mxu0 %v3899_v18 }
  0xa8   :  { %300 = vmatmul.mubr.f32.gmra.mxu0 %v2572_v3  ;;  %v1077_v3 = vld [vmem:[%s3893_s4 + $0xc8] sm:$0xff] }
  0xa9   :  { %305 = vmatprep.mubr.f32.mxu0 %v3899_v18  ;;  %1136 = vmatpush2.msra.mxu0 %v1077_v3  ;;  %v3021_v3 = vld [vmem:[%s3894_s6 + $0x38] sm:$0xff] }
  0xaa   :  { %1137 = vmatprep.subr.mxu0 %v3899_v18 }
  0xac   :  { %306 = vmatmul.mubr.f32.gmra.mxu0 %v2577_v5  ;;  %v1076_v5 = vld [vmem:[%s3893_s4 + $0xc0] sm:$0xff] }
  0xad   :  { %311 = vmatprep.mubr.f32.mxu0 %v3899_v18  ;;  %1138 = vmatpush2.msra.mxu0 %v1076_v5  ;;  %v3035_v5 = vld [vmem:[%s3894_s6 + $0x28] sm:$0xff] }
  0xae   :  { %1139 = vmatprep.subr.mxu0 %v3899_v18 }
  0xb0   :  { %312 = vmatmul.mubr.f32.gmra.mxu0 %v2584_v6  ;;  %v1075_v6 = vld [vmem:[%s3893_s4 + $0xb8] sm:$0xff] }
  0xb1   :  { %317 = vmatprep.mubr.f32.mxu0 %v3899_v18  ;;  %1140 = vmatpush2.msra.mxu0 %v1075_v6 }
  0xb2   :  { %1141 = vmatprep.subr.mxu0 %v3899_v18 }
  0xb4   :  { %318 = vmatmul.mubr.f32.gmra.mxu0 %v2589_v7  ;;  %v1074_v7 = vld [vmem:[%s3893_s4 + $0xb0] sm:$0xff] }
  0xb5   :  { %323 = vmatprep.mubr.f32.mxu0 %v3899_v18  ;;  %1142 = vmatpush2.msra.mxu0 %v1074_v7  ;;  %v3067_v7 = vld [vmem:[%s3894_s6 + $0x8] sm:$0xff] }
  0xb6   :  { %1143 = vmatprep.subr.mxu0 %v3899_v18 }
  0xb8   :  { %324 = vmatmul.mubr.f32.gmra.mxu0 %v2596_v8  ;;  %v1073_v8 = vld [vmem:[%s3893_s4 + $0xa8] sm:$0xff] }
  0xb9   :  { %329 = vmatprep.mubr.f32.mxu0 %v3899_v18  ;;  %1144 = vmatpush2.msra.mxu0 %v1073_v8 }
  0xba   :  { %1145 = vmatprep.subr.mxu0 %v3899_v18 }
  0xbc   :  { %330 = vmatmul.mubr.f32.gmra.mxu0 %v2601_v9  ;;  %v1072_v9 = vld [vmem:[%s3893_s4 + $0xa0] sm:$0xff] }
  0xbd   :  { %335 = vmatprep.mubr.f32.mxu0 %v3899_v18  ;;  %1146 = vmatpush2.msra.mxu0 %v1072_v9  ;;  %v3094_v9 = vld [vmem:[%s3894_s6 + $0xf0] sm:$0xff] }
  0xbe   :  { %1147 = vmatprep.subr.mxu0 %v3899_v18 }
  0xc0   :  { %336 = vmatmul.mubr.f32.gmra.mxu0 %v2608_v10  ;;  %v1071_v10 = vld [vmem:[%s3893_s4 + $0x98] sm:$0xff] }
  0xc1   :  { %341 = vmatprep.mubr.f32.mxu0 %v3899_v18  ;;  %1148 = vmatpush2.msra.mxu0 %v1071_v10 }
  0xc2   :  { %1149 = vmatprep.subr.mxu0 %v3899_v18 }
  0xc4   :  { %342 = vmatmul.mubr.f32.gmra.mxu0 %v2613_v11  ;;  %v1070_v11 = vld [vmem:[%s3893_s4 + $0x90] sm:$0xff] }
  0xc5   :  { %347 = vmatprep.mubr.f32.mxu0 %v3899_v18  ;;  %1150 = vmatpush2.msra.mxu0 %v1070_v11  ;;  %v3121_v11 = vld [vmem:[%s3894_s6 + $0xd8] sm:$0xff] }
  0xc6   :  { %1151 = vmatprep.subr.mxu0 %v3899_v18 }
  0xc8   :  { %348 = vmatmul.mubr.f32.gmra.mxu0 %v2620_v12 }
  0xc9   :  { %353 = vmatprep.mubr.f32.mxu0 %v3899_v18 }
  0xcc   :  { %354 = vmatmul.mubr.f32.gmra.mxu0 %v2625_v13  ;;  %v1069_v13 = vld [vmem:[%s3893_s4 + $0x88] sm:$0xff] }
  0xcd   :  { %359 = vmatprep.mubr.f32.mxu0 %v3899_v18  ;;  %1152 = vmatpush2.msra.mxu0 %v1069_v13 }
  0xce   :  { %1153 = vmatprep.subr.mxu0 %v3899_v18 }
  0xd0   :  { %360 = vmatmul.mubr.f32.gmra.mxu0 %v2632_v14  ;;  %v1068_v14 = vld [vmem:[%s3893_s4 + $0x80] sm:$0xff] }
  0xd1   :  { %1154 = vmatpush2.msra.mxu0 %v1068_v14 }
  0xd2   :  { %1355 = vmatprep.subr.mxu0 %v3899_v18 }
  0xe2   :  { %v2020_v49 = vpop.f32.mrf.mxu1 }
  0xe3   :  { %v596_v28 = vmax.f32 %v2020_v49, 0.0 }
  0xe4   :  { %v432_v24 = vpop.f32.mrf.mxu1 }
  0xe5   :  { %v593_v26 = vmax.f32 %v432_v24, 0.0 }
  0xe6   :  { %v2023_v27 = vpop.f32.mrf.mxu1 }
  0xe7   :  { %796 = vmatmul.mubr.f32.vlgmr.msra.gmra.mxu1 %v593_v26  ;;  %v602_v34 = vmax.f32 %v2023_v27, 0.0 }
  0xe8   :  { %801 = vmatprep.mubr.f32.mxu1 %v3899_v18  ;;  %v442_v30 = vpop.f32.mrf.mxu1  ;;  %2098 = vmatpush1.msra.mxu1 %v2962_v61 }
  0xe9   :  { %v599_v32 = vmax.f32 %v442_v30, 0.0  ;;  %2067 = vmatprep.subr.mxu1 %v3899_v18 }
  0xea   :  { %v2026_v33 = vpop.f32.mrf.mxu1  ;;  %2099 = vmatpush1.msra.mxu1 %v2969_v63 }
  0xeb   :  { %802 = vmatmul.mubr.f32.gmra.mxu1 %v596_v28  ;;  %v608_v40 = vmax.f32 %v2026_v33, 0.0  ;;  %2068 = vmatprep.subr.mxu1 %v3899_v18 }
  0xec   :  { %807 = vmatprep.mubr.f32.mxu1 %v3899_v18  ;;  %v452_v36 = vpop.f32.mrf.mxu1 }
  0xed   :  { %v605_v38 = vmax.f32 %v452_v36, 0.0 }
  0xee   :  { %v2029_v39 = vpop.f32.mrf.mxu1 }
  0xef   :  { %808 = vmatmul.mubr.f32.gmra.mxu1 %v599_v32  ;;  %v614_v46 = vmax.f32 %v2029_v39, 0.0 }
  0xf0   :  { %813 = vmatprep.mubr.f32.mxu1 %v3899_v18  ;;  %v462_v42 = vpop.f32.mrf.mxu1 }
  0xf1   :  { %v611_v44 = vmax.f32 %v462_v42, 0.0  ;;  %v2991_v42 = vld [vmem:[%s3894_s6 + $0x58] sm:$0xff] }
  0xf2   :  { %v2032_v45 = vpop.f32.mrf.mxu1 }
  0xf3   :  { %814 = vmatmul.mubr.f32.gmra.mxu1 %v602_v34  ;;  %v620_v52 = vmax.f32 %v2032_v45, 0.0  ;;  %v2998_v45 = vld [vmem:[%s3894_s6 + $0x50] sm:$0xff] }
  0xf4   :  { %819 = vmatprep.mubr.f32.mxu1 %v3899_v18  ;;  %v472_v48 = vpop.f32.mrf.mxu1 }
  0xf5   :  { %v617_v50 = vmax.f32 %v472_v48, 0.0  ;;  %v3013_v48 = vld [vmem:[%s3894_s6 + $0x40] sm:$0xff] }
  0xf6   :  { %v2035_v51 = vpop.f32.mrf.mxu1 }
  0xf7   :  { %820 = vmatmul.mubr.f32.gmra.mxu1 %v605_v38  ;;  %v626_v58 = vmax.f32 %v2035_v51, 0.0  ;;  %v2976_v38 = vld [vmem:[%s3894_s6 + $0x68] sm:$0xff]  ;;  %v3028_v51 = vld [vmem:[%s3894_s6 + $0x30] sm:$0xff] }
  0xf8   :  { %825 = vmatprep.mubr.f32.mxu1 %v3899_v18  ;;  %v482_v54 = vpop.f32.mrf.mxu1  ;;  %2100 = vmatpush1.msra.mxu1 %v2976_v38 }
  0xf9   :  { %v623_v56 = vmax.f32 %v482_v54, 0.0  ;;  %2069 = vmatprep.subr.mxu1 %v3899_v18  ;;  %v3049_v54 = vld [vmem:[%s3894_s6 + $0x18] sm:$0xff] }
  0xfa   :  { %v2038_v57 = vpop.f32.mrf.mxu1 }
  0xfb   :  { %826 = vmatmul.mubr.f32.gmra.mxu1 %v608_v40  ;;  %v632_v16 = vmax.f32 %v2038_v57, 0.0  ;;  %v2983_v40 = vld [vmem:[%s3894_s6 + $0x60] sm:$0xff] }
  0xfc   :  { %831 = vmatprep.mubr.f32.mxu1 %v3899_v18  ;;  %v492_v60 = vpop.f32.mrf.mxu1  ;;  %2101 = vmatpush1.msra.mxu1 %v2983_v40 }
  0xfd   :  { %v629_v62 = vmax.f32 %v492_v60, 0.0  ;;  %2070 = vmatprep.subr.mxu1 %v3899_v18  ;;  %v3076_v60 = vld [vmem:[%s3894_s6] sm:$0xff] }
  0xfe   :  { %v2041_v15 = vpop.f32.mrf.mxu1  ;;  %2102 = vmatpush1.msra.mxu1 %v2991_v42 }
  0xff   :  { %832 = vmatmul.mubr.f32.gmra.mxu1 %v611_v44  ;;  %v638_v17 = vmax.f32 %v2041_v15, 0.0  ;;  %2071 = vmatprep.subr.mxu1 %v3899_v18 }
 0x100   :  { %837 = vmatprep.mubr.f32.mxu1 %v3899_v18  ;;  %v502_v20 = vpop.f32.mrf.mxu1  ;;  %2103 = vmatpush1.msra.mxu1 %v2998_v45 }
 0x101   :  { %v635_v21 = vmax.f32 %v502_v20, 0.0  ;;  %2072 = vmatprep.subr.mxu1 %v3899_v18  ;;  %v3103_v20 = vld [vmem:[%s3894_s6 + $0xe8] sm:$0xff] }
 0x102   :  { %v2044_v4 = vpop.f32.mrf.mxu1  ;;  %2104 = vmatpush1.msra.mxu1 %v3006_v2 }
 0x103   :  { %838 = vmatmul.mubr.f32.gmra.mxu1 %v614_v46  ;;  %v644_v25 = vmax.f32 %v2044_v4, 0.0  ;;  %2073 = vmatprep.subr.mxu1 %v3899_v18 }
 0x104   :  { %843 = vmatprep.mubr.f32.mxu1 %v3899_v18  ;;  %v512_v19 = vpop.f32.mrf.mxu1  ;;  %2105 = vmatpush1.msra.mxu1 %v3013_v48 }
 0x105   :  { %v641_v12 = vmax.f32 %v512_v19, 0.0  ;;  %2074 = vmatprep.subr.mxu1 %v3899_v18  ;;  %v3130_v19 = vld [vmem:[%s3894_s6 + $0xd0] sm:$0xff] }
 0x106   :  { %v2047_v23 = vpop.f32.mrf.mxu1  ;;  %2106 = vmatpush1.msra.mxu1 %v3021_v3 }
 0x107   :  { %844 = vmatmul.mubr.f32.gmra.mxu1 %v617_v50  ;;  %v650_v37 = vmax.f32 %v2047_v23, 0.0  ;;  %2075 = vmatprep.subr.mxu1 %v3899_v18  ;;  %v3139_v23 = vld [vmem:[%s3894_s6 + $0xc8] sm:$0xff] }
 0x108   :  { %849 = vmatprep.mubr.f32.mxu1 %v3899_v18  ;;  %v522_v29 = vpop.f32.mrf.mxu1  ;;  %2107 = vmatpush1.msra.mxu1 %v3028_v51 }
 0x109   :  { %v647_v31 = vmax.f32 %v522_v29, 0.0  ;;  %2076 = vmatprep.subr.mxu1 %v3899_v18  ;;  %v3148_v29 = vld [vmem:[%s3894_s6 + $0xc0] sm:$0xff] }
 0x10a   :  { %v2050_v35 = vpop.f32.mrf.mxu1  ;;  %2108 = vmatpush1.msra.mxu1 %v3035_v5 }
 0x10b   :  { %850 = vmatmul.mubr.f32.gmra.mxu1 %v620_v52  ;;  %v656_v49 = vmax.f32 %v2050_v35, 0.0  ;;  %v3042_v52 = vld [vmem:[%s3894_s6 + $0x20] sm:$0xff]  ;;  %2077 = vmatprep.subr.mxu1 %v3899_v18  ;;  %v3166_v35 = vld [vmem:[%s3894_s6 + $0xb0] sm:$0xff] }
 0x10c   :  { %855 = vmatprep.mubr.f32.mxu1 %v3899_v18  ;;  %v532_v41 = vpop.f32.mrf.mxu1  ;;  %2109 = vmatpush1.msra.mxu1 %v3042_v52 }
 0x10d   :  { %v653_v43 = vmax.f32 %v532_v41, 0.0  ;;  %2078 = vmatprep.subr.mxu1 %v3899_v18  ;;  %v3175_v41 = vld [vmem:[%s3894_s6 + $0xa8] sm:$0xff] }
 0x10e   :  { %v2053_v47 = vpop.f32.mrf.mxu1  ;;  %2110 = vmatpush1.msra.mxu1 %v3049_v54 }
 0x10f   :  { %856 = vmatmul.mubr.f32.gmra.mxu1 %v623_v56  ;;  %v662_v26 = vmax.f32 %v2053_v47, 0.0  ;;  %v3058_v56 = vld [vmem:[%s3894_s6 + $0x10] sm:$0xff]  ;;  %2079 = vmatprep.subr.mxu1 %v3899_v18  ;;  %v3184_v47 = vld [vmem:[%s3894_s6 + $0xa0] sm:$0xff] }
 0x110   :  { %861 = vmatprep.mubr.f32.mxu1 %v3899_v18  ;;  %v542_v22 = vpop.f32.mrf.mxu1  ;;  %2111 = vmatpush1.msra.mxu1 %v3058_v56 }
 0x111   :  { %v659_v24 = vmax.f32 %v542_v22, 0.0  ;;  %2080 = vmatprep.subr.mxu1 %v3899_v18  ;;  %v3193_v22 = vld [vmem:[%s3894_s6 + $0x98] sm:$0xff] }
 0x112   :  { %v2056_v53 = vpop.f32.mrf.mxu1  ;;  %2112 = vmatpush1.msra.mxu1 %v3067_v7 }
 0x113   :  { %862 = vmatmul.mubr.f32.gmra.mxu1 %v626_v58  ;;  %v668_v30 = vmax.f32 %v2056_v53, 0.0  ;;  %2081 = vmatprep.subr.mxu1 %v3899_v18  ;;  %v3200_v53 = vld [vmem:[%s3894_s6 + $0x90] sm:$0xff] }
 0x114   :  { %867 = vmatprep.mubr.f32.mxu1 %v3899_v18  ;;  %v552_v27 = vpop.f32.mrf.mxu1  ;;  %v3053_v6 = vpop.f32.mrf.mxu0  ;;  %2113 = vmatpush1.msra.mxu1 %v3076_v60 }
 0x115   :  { %v665_v55 = vmax.f32 %v552_v27, 0.0  ;;  %2082 = vmatprep.subr.mxu1 %v3899_v18  ;;  %v3207_v27 = vld [vmem:[%s3894_s6 + $0x88] sm:$0xff] }
 0x116   :  { %v2059_v28 = vpop.f32.mrf.mxu1  ;;  %v3062_v57 = vpop.f32.mrf.mxu0 }
 0x117   :  { %868 = vmatmul.mubr.f32.gmra.mxu1 %v629_v62  ;;  %v674_v34 = vmax.f32 %v2059_v28, 0.0  ;;  %v3085_v62 = vld [vmem:[%s3894_s6 + $0xf8] sm:$0xff] }
 0x118   :  { %873 = vmatprep.mubr.f32.mxu1 %v3899_v18  ;;  %v562_v59 = vpop.f32.mrf.mxu1  ;;  %v3071_v58 = vpop.f32.mrf.mxu0  ;;  %2114 = vmatpush2.msra.mxu1 %v3085_v62 }
 0x119   :  { %v671_v32 = vmax.f32 %v562_v59, 0.0  ;;  %2083 = vmatprep.subr.mxu1 %v3899_v18  ;;  %v3214_v59 = vld [vmem:[%s3894_s6 + $0x80] sm:$0xff] }
 0x11a   :  { %v2062_v33 = vpop.f32.mrf.mxu1  ;;  %v3080_v8 = vpop.f32.mrf.mxu0  ;;  %2115 = vmatpush2.msra.mxu1 %v3094_v9 }
 0x11b   :  { %874 = vmatmul.mubr.f32.gmra.mxu1 %v632_v16  ;;  %v680_v1 = vmax.f32 %v2062_v33, 0.0  ;;  %2084 = vmatprep.subr.mxu1 %v3899_v18 }
 0x11c   :  { %879 = vmatprep.mubr.f32.mxu1 %v3899_v18  ;;  %v572_v36 = vpop.f32.mrf.mxu1  ;;  %v3089_v15 = vpop.f32.mrf.mxu0  ;;  %2116 = vmatpush2.msra.mxu1 %v3103_v20 }
 0x11d   :  { %v677_v39 = vmax.f32 %v572_v36, 0.0  ;;  %2085 = vmatprep.subr.mxu1 %v3899_v18 }
 0x11e   :  { %v2065_v0 = vpop.f32.mrf.mxu1  ;;  %v3098_v16 = vpop.f32.mrf.mxu0 }
 0x11f   :  { %880 = vmatmul.mubr.f32.gmra.mxu1 %v635_v21  ;;  %v686_v50 = vmax.f32 %v2065_v0, 0.0  ;;  %v3112_v21 = vld [vmem:[%s3894_s6 + $0xe0] sm:$0xff] }
 0x120   :  { %885 = vmatprep.mubr.f32.mxu1 %v3899_v18  ;;  %v582_v44 = vpop.f32.mrf.mxu1  ;;  %v3107_v10 = vpop.f32.mrf.mxu0  ;;  %2117 = vmatpush2.msra.mxu1 %v3112_v21 }
 0x121   :  { %v683_v46 = vmax.f32 %v582_v44, 0.0  ;;  %2086 = vmatprep.subr.mxu1 %v3899_v18 }
 0x122   :  { %v3116_v4 = vpop.f32.mrf.mxu0  ;;  %2118 = vmatpush2.msra.mxu1 %v3121_v11 }
 0x123   :  { %886 = vmatmul.mubr.f32.gmra.mxu1 %v638_v17  ;;  %2087 = vmatprep.subr.mxu1 %v3899_v18 }
 0x124   :  { %891 = vmatprep.mubr.f32.mxu1 %v3899_v18  ;;  %v3125_v17 = vpop.f32.mrf.mxu0  ;;  %2119 = vmatpush2.msra.mxu1 %v3130_v19 }
 0x125   :  { %2088 = vmatprep.subr.mxu1 %v3899_v18 }
 0x126   :  { %2120 = vmatpush2.msra.mxu1 %v3139_v23 }
 0x127   :  { %892 = vmatmul.mubr.f32.gmra.mxu1 %v641_v12  ;;  %v3134_v12 = vpop.f32.mrf.mxu0  ;;  %2089 = vmatprep.subr.mxu1 %v3899_v18 }
 0x128   :  { %897 = vmatprep.mubr.f32.mxu1 %v3899_v18  ;;  %2121 = vmatpush2.msra.mxu1 %v3148_v29 }
 0x129   :  { %2090 = vmatprep.subr.mxu1 %v3899_v18 }
 0x12b   :  { %898 = vmatmul.mubr.f32.gmra.mxu1 %v644_v25  ;;  %v3143_v25 = vpop.f32.mrf.mxu0 }
 0x12c   :  { %903 = vmatprep.mubr.f32.mxu1 %v3899_v18 }
 0x12d   :  { %v3152_v13 = vpop.f32.mrf.mxu0 }
 0x12f   :  { %904 = vmatmul.mubr.f32.gmra.mxu1 %v647_v31  ;;  %v3157_v31 = vld [vmem:[%s3894_s6 + $0xb8] sm:$0xff]  ;;  %v3161_v14 = vpop.f32.mrf.mxu0 }
 0x130   :  { %909 = vmatprep.mubr.f32.mxu1 %v3899_v18  ;;  %2122 = vmatpush2.msra.mxu1 %v3157_v31  ;;  %3901 = vst [vmem:[#allocation2_spill] sm:$0xff] %v3161_v14 }
 0x131   :  { %2091 = vmatprep.subr.mxu1 %v3899_v18 }
 0x132   :  { %2123 = vmatpush2.msra.mxu1 %v3166_v35 }
 0x133   :  { %910 = vmatmul.mubr.f32.gmra.mxu1 %v650_v37  ;;  %v3170_v37 = vpop.f32.mrf.mxu0  ;;  %2092 = vmatprep.subr.mxu1 %v3899_v18 }
 0x134   :  { %915 = vmatprep.mubr.f32.mxu1 %v3899_v18  ;;  %3902 = vst [vmem:[#allocation3_spill] sm:$0xff] %v3170_v37  ;;  %2124 = vmatpush2.msra.mxu1 %v3175_v41 }
 0x135   :  { %2093 = vmatprep.subr.mxu1 %v3899_v18 }
 0x136   :  { %2125 = vmatpush2.msra.mxu1 %v3184_v47 }
 0x137   :  { %916 = vmatmul.mubr.f32.gmra.mxu1 %v653_v43  ;;  %v3179_v43 = vpop.f32.mrf.mxu0  ;;  %2094 = vmatprep.subr.mxu1 %v3899_v18 }
 0x138   :  { %921 = vmatprep.mubr.f32.mxu1 %v3899_v18  ;;  %3903 = vst [vmem:[#allocation4_spill] sm:$0xff] %v3179_v43  ;;  %2126 = vmatpush2.msra.mxu1 %v3193_v22 }
 0x139   :  { %2095 = vmatprep.subr.mxu1 %v3899_v18 }
 0x13a   :  { %2127 = vmatpush2.msra.mxu1 %v3200_v53 }
 0x13b   :  { %922 = vmatmul.mubr.f32.gmra.mxu1 %v656_v49  ;;  %v3188_v49 = vpop.f32.mrf.mxu0  ;;  %2096 = vmatprep.subr.mxu1 %v3899_v18 }
 0x13c   :  { %927 = vmatprep.mubr.f32.mxu1 %v3899_v18  ;;  %3904 = vst [vmem:[#allocation5_spill] sm:$0xff] %v3188_v49  ;;  %2128 = vmatpush2.msra.mxu1 %v3207_v27 }
 0x13d   :  { %2097 = vmatprep.subr.mxu1 %v3899_v18 }
 0x13e   :  { %2129 = vmatpush2.msra.mxu1 %v3214_v59 }
 0x13f   :  { %928 = vmatmul.mubr.f32.gmra.mxu1 %v659_v24  ;;  %v223_v24 = vpop.f32.mrf.mxu0 }
 0x140   :  { %933 = vmatprep.mubr.f32.mxu1 %v3899_v18 }
 0x143   :  { %934 = vmatmul.mubr.f32.gmra.mxu1 %v662_v26  ;;  %v225_v26 = vpop.f32.mrf.mxu0 }
 0x144   :  { %939 = vmatprep.mubr.f32.mxu1 %v3899_v18  ;;  %v616_v28 = vmax.f32 %v225_v26, 0.0 }
 0x147   :  { %940 = vmatmul.mubr.f32.gmra.mxu1 %v665_v55  ;;  %v615_v55 = vmax.f32 %v223_v24, 0.0 }
 0x148   :  { %945 = vmatprep.mubr.f32.mxu1 %v3899_v18 }
 0x14b   :  { %946 = vmatmul.mubr.f32.gmra.mxu1 %v668_v30  ;;  %v229_v30 = vpop.f32.mrf.mxu0 }
 0x14c   :  { %951 = vmatprep.mubr.f32.mxu1 %v3899_v18  ;;  %v618_v33 = vmax.f32 %v229_v30, 0.0 }
 0x14f   :  { %952 = vmatmul.mubr.f32.gmra.mxu1 %v671_v32  ;;  %v231_v32 = vpop.f32.mrf.mxu0 }
 0x150   :  { %957 = vmatprep.mubr.f32.mxu1 %v3899_v18 }
 0x151   :  { %v235_v36 = vpop.f32.mrf.mxu0 }
 0x152   :  { %v621_v0 = vmax.f32 %v235_v36, 0.0 }
 0x153   :  { %958 = vmatmul.mubr.f32.gmra.mxu1 %v674_v34  ;;  %v619_v34 = vmax.f32 %v231_v32, 0.0 }
 0x154   :  { %963 = vmatprep.mubr.f32.mxu1 %v3899_v18 }
 0x157   :  { %964 = vmatmul.mubr.f32.gmra.mxu1 %v677_v39  ;;  %v237_v39 = vpop.f32.mrf.mxu0 }
 0x158   :  { %969 = vmatprep.mubr.f32.mxu1 %v3899_v18 }
 0x159   :  { %v241_v44 = vpop.f32.mrf.mxu0 }
 0x15a   :  { %v624_v24 = vmax.f32 %v241_v44, 0.0 }
 0x15b   :  { %970 = vmatmul.mubr.f32.gmra.mxu1 %v680_v1  ;;  %v622_v1 = vmax.f32 %v237_v39, 0.0 }
 0x15c   :  { %975 = vmatprep.mubr.f32.mxu1 %v3899_v18 }
 0x15f   :  { %976 = vmatmul.mubr.f32.gmra.mxu1 %v683_v46  ;;  %v243_v46 = vpop.f32.mrf.mxu0 }
 0x160   :  { %981 = vmatprep.mubr.f32.mxu1 %v3899_v18  ;;  %v625_v26 = vmax.f32 %v243_v46, 0.0 }
 0x163   :  { %982 = vmatmul.mubr.f32.gmra.mxu1 %v686_v50  ;;  %v721_v50 = vlaneseq }
 0x164   :  { %1459 = vmatprep.mubr.f32.mxu1 %v616_v28  ;;  %v247_v28 = vpop.f32.mrf.mxu0 }
 0x165   :  { %v722_v43 = vshrl.u32 %v721_v50, 7  ;;  %v627_v30 = vmax.f32 %v247_v28, 0.0 }
 0x166   :  { %v249_v18 = vpop.f32.mrf.mxu0 }
 0x167   :  { %1460 = vmatmul.mubr.f32.vlgmr.msra.gmra.mxu1 %v615_v55  ;;  %v628_v32 = vmax.f32 %v249_v18, 0.0  ;;  %v723_v36 = vsub.s32 0, %v722_v43  ;;  %v727_v44 = vsub.s32 1, %v722_v43 }
 0x168   :  { %1464 = vmatprep.mubr.f32.mxu1 %v619_v34  ;;  %v253_v55 = vpop.f32.mrf.mxu0 }
 0x169   :  { %v630_v39 = vmax.f32 %v253_v55, 0.0 }
 0x16a   :  { %v255_v34 = vpop.f32.mrf.mxu0 }
 0x16b   :  { %1465 = vmatmul.mubr.f32.gmra.mxu1 %v618_v33  ;;  %v631_v33 = vmax.f32 %v255_v34, 0.0 }
 0x16c   :  { %1469 = vmatprep.mubr.f32.mxu1 %v622_v1  ;;  %v719_v1 = vld [vmem:[%s3895_s3] sm:$0x3] }
 0x16f   :  { %1470 = vmatmul.mubr.f32.gmra.mxu1 %v621_v0  ;;  %v259_v0 = vpop.f32.mrf.mxu0 }
 0x170   :  { %1474 = vmatprep.mubr.f32.mxu1 %v625_v26  ;;  %v3221_v26 = vrot.slane %v719_v1, %v723_v36  ;;  %v633_v50 = vmax.f32 %v259_v0, 0.0 }
 0x171   :  { %v261_v46 = vpop.f32.mrf.mxu0 }
 0x172   :  { %v634_v18 = vmax.f32 %v261_v46, 0.0 }
 0x173   :  { %1475 = vmatmul.mubr.f32.gmra.mxu1 %v624_v24  ;;  %v3223_v24 = vrot.slane %v719_v1, %v727_v44  ;;  %v265_v28 = vpop.f32.mrf.mxu0 }
 0x174   :  { %1479 = vmatprep.mubr.f32.mxu1 %v628_v32  ;;  %v636_v49 = vmax.f32 %v265_v28, 0.0 }
 0x175   :  { %v267_v55 = vpop.f32.mrf.mxu0 }
 0x176   :  { %v637_v14 = vmax.f32 %v267_v55, 0.0 }
 0x177   :  { %1480 = vmatmul.mubr.f32.gmra.mxu1 %v627_v30 }
 0x178   :  { %1484 = vmatprep.mubr.f32.mxu1 %v631_v33  ;;  %v271_v33 = vpop.f32.mrf.mxu0 }
 0x179   :  { %v639_v37 = vmax.f32 %v271_v33, 0.0 }
 0x17a   :  { %v273_v46 = vpop.f32.mrf.mxu0 }
 0x17b   :  { %1485 = vmatmul.mubr.f32.gmra.mxu1 %v630_v39 }
 0x17c   :  { %1489 = vmatprep.mubr.f32.mxu1 %v634_v18  ;;  %v640_v18 = vmax.f32 %v273_v46, 0.0  ;;  %v277_v28 = vpop.f32.mrf.mxu0 }
 0x17d   :  { %v642_v33 = vmax.f32 %v277_v28, 0.0 }
 0x17f   :  { %1490 = vmatmul.mubr.f32.gmra.mxu1 %v633_v50 }
 0x180   :  { %1494 = vmatprep.mubr.f32.mxu1 %v637_v14  ;;  %v279_v14 = vpop.f32.mrf.mxu0 }
 0x181   :  { %v643_v46 = vmax.f32 %v279_v14, 0.0 }
 0x183   :  { %1495 = vmatmul.mubr.f32.gmra.mxu1 %v636_v49 }
 0x184   :  { %1499 = vmatprep.mubr.f32.mxu1 %v640_v18 }
 0x187   :  { %1500 = vmatmul.mubr.f32.gmra.mxu1 %v639_v37 }
 0x188   :  { %1504 = vmatprep.mubr.f32.mxu1 %v643_v46 }
 0x18b   :  { %1505 = vmatmul.mubr.f32.gmra.mxu1 %v642_v33 }
 0x1a7   :  { %v797_v32 = vpop.f32.mrf.mxu1 }
 0x1a8   :  { %v798_v30 = vadd.f32 %v797_v32, %v3221_v26 }
 0x1a9   :  { %v799_v34 = vpop.f32.mrf.mxu1 }
 0x1aa   :  { %v800_v43 = vadd.f32 %v799_v34, %v3223_v24  ;;  %v988_v39 = vmax.f32 %v798_v30, 0.0 }
 0x1ab   :  { %v803_v36 = vpop.f32.mrf.mxu1 }
 0x1ac   :  { %v989_v0 = vmax.f32 %v800_v43, 0.0  ;;  %v804_v1 = vadd.f32 %v803_v36, %v3221_v26  ;;  %v3905_v36 = vmov 0.0  }
 0x1ad   :  { %v805_v44 = vpop.f32.mrf.mxu1 }
 0x1ae   :  { %v806_v32 = vadd.f32 %v805_v44, %v3223_v24  ;;  %1155 = vmatprep.mubr.f32.mxu0 %v989_v0  ;;  %v990_v34 = vmax.f32 %v804_v1, 0.0  ;;  %v283_v0 = vpop.f32.mrf.mxu0 }
 0x1af   :  { %v809_v55 = vpop.f32.mrf.mxu1  ;;  %1156 = vmatmul.mubr.f32.vlgmr.msra.gmra.mxu0 %v988_v39  ;;  %v645_v37 = vmax.f32 %v283_v0, 0.0 }
 0x1b0   :  { %v991_v50 = vmax.f32 %v806_v32, 0.0  ;;  %1356 = vmatpush1.msra.mxu0 %v2962_v61  ;;  %v810_v30 = vadd.f32 %v809_v55, %v3221_v26  ;;  %v285_v1 = vpop.f32.mrf.mxu0 }
 0x1b1   :  { %v811_v43 = vpop.f32.mrf.mxu1  ;;  %1357 = vmatprep.subr.mxu0 %v3905_v36  ;;  %v646_v28 = vmax.f32 %v285_v1, 0.0 }
 0x1b2   :  { %v812_v49 = vadd.f32 %v811_v43, %v3223_v24  ;;  %1160 = vmatprep.mubr.f32.mxu0 %v991_v50  ;;  %1358 = vmatpush1.msra.mxu0 %v2969_v63  ;;  %v992_v44 = vmax.f32 %v810_v30, 0.0  ;;  %v289_v55 = vpop.f32.mrf.mxu0 }
 0x1b3   :  { %v815_v39 = vpop.f32.mrf.mxu1  ;;  %1161 = vmatmul.mubr.f32.gmra.mxu0 %v990_v34  ;;  %1359 = vmatprep.subr.mxu0 %v3905_v36  ;;  %v648_v33 = vmax.f32 %v289_v55, 0.0 }
 0x1b4   :  { %v993_v61 = vmax.f32 %v812_v49, 0.0  ;;  %1360 = vmatpush1.msra.mxu0 %v2976_v38  ;;  %v816_v18 = vadd.f32 %v815_v39, %v3221_v26  ;;  %1509 = vmatprep.mubr.f32.mxu1 %v646_v28  ;;  %v291_v14 = vpop.f32.mrf.mxu0 }
 0x1b5   :  { %v817_v32 = vpop.f32.mrf.mxu1  ;;  %1361 = vmatprep.subr.mxu0 %v3905_v36  ;;  %v649_v46 = vmax.f32 %v291_v14, 0.0  ;;  %1510 = vmatmul.mubr.f32.gmra.mxu1 %v645_v37 }
 0x1b6   :  { %v818_v63 = vadd.f32 %v817_v32, %v3223_v24  ;;  %1165 = vmatprep.mubr.f32.mxu0 %v993_v61  ;;  %1362 = vmatpush1.msra.mxu0 %v2983_v40  ;;  %v994_v34 = vmax.f32 %v816_v18, 0.0  ;;  %v295_v49 = vpop.f32.mrf.mxu0 }
 0x1b7   :  { %v821_v50 = vpop.f32.mrf.mxu1  ;;  %1166 = vmatmul.mubr.f32.gmra.mxu0 %v992_v44  ;;  %1363 = vmatprep.subr.mxu0 %v3905_v36  ;;  %v651_v18 = vmax.f32 %v295_v49, 0.0 }
 0x1b8   :  { %v995_v38 = vmax.f32 %v818_v63, 0.0  ;;  %1364 = vmatpush1.msra.mxu0 %v2991_v42  ;;  %v822_v30 = vadd.f32 %v821_v50, %v3221_v26  ;;  %1514 = vmatprep.mubr.f32.mxu1 %v649_v46  ;;  %v297_v39 = vpop.f32.mrf.mxu0 }
 0x1b9   :  { %v823_v43 = vpop.f32.mrf.mxu1  ;;  %1365 = vmatprep.subr.mxu0 %v3905_v36  ;;  %v652_v32 = vmax.f32 %v297_v39, 0.0  ;;  %1515 = vmatmul.mubr.f32.gmra.mxu1 %v648_v33 }
 0x1ba   :  { %v824_v40 = vadd.f32 %v823_v43, %v3223_v24  ;;  %1170 = vmatprep.mubr.f32.mxu0 %v995_v38  ;;  %1366 = vmatpush1.msra.mxu0 %v2998_v45  ;;  %v996_v61 = vmax.f32 %v822_v30, 0.0  ;;  %v301_v37 = vpop.f32.mrf.mxu0 }
 0x1bb   :  { %v827_v0 = vpop.f32.mrf.mxu1  ;;  %1171 = vmatmul.mubr.f32.gmra.mxu0 %v994_v34  ;;  %1367 = vmatprep.subr.mxu0 %v3905_v36  ;;  %v654_v14 = vmax.f32 %v301_v37, 0.0 }
 0x1bc   :  { %v997_v42 = vmax.f32 %v824_v40, 0.0  ;;  %1368 = vmatpush1.msra.mxu0 %v3006_v2  ;;  %v828_v1 = vadd.f32 %v827_v0, %v3221_v26  ;;  %1519 = vmatprep.mubr.f32.mxu1 %v652_v32  ;;  %v303_v63 = vpop.f32.mrf.mxu0 }
 0x1bd   :  { %v829_v44 = vpop.f32.mrf.mxu1  ;;  %1369 = vmatprep.subr.mxu0 %v3905_v36  ;;  %v655_v34 = vmax.f32 %v303_v63, 0.0  ;;  %1520 = vmatmul.mubr.f32.gmra.mxu1 %v651_v18 }
 0x1be   :  { %v830_v45 = vadd.f32 %v829_v44, %v3223_v24  ;;  %1175 = vmatprep.mubr.f32.mxu0 %v997_v42  ;;  %1370 = vmatpush1.msra.mxu0 %v3013_v48  ;;  %v998_v55 = vmax.f32 %v828_v1, 0.0  ;;  %v307_v30 = vpop.f32.mrf.mxu0 }
 0x1bf   :  { %v833_v28 = vpop.f32.mrf.mxu1  ;;  %1176 = vmatmul.mubr.f32.gmra.mxu0 %v996_v61  ;;  %1371 = vmatprep.subr.mxu0 %v3905_v36  ;;  %v657_v0 = vmax.f32 %v307_v30, 0.0 }
 0x1c0   :  { %v999_v2 = vmax.f32 %v830_v45, 0.0  ;;  %1372 = vmatpush1.msra.mxu0 %v3021_v3  ;;  %v834_v50 = vadd.f32 %v833_v28, %v3221_v26  ;;  %1524 = vmatprep.mubr.f32.mxu1 %v655_v34  ;;  %v309_v33 = vpop.f32.mrf.mxu0 }
 0x1c1   :  { %v835_v38 = vpop.f32.mrf.mxu1  ;;  %1373 = vmatprep.subr.mxu0 %v3905_v36  ;;  %v658_v42 = vmax.f32 %v309_v33, 0.0  ;;  %1525 = vmatmul.mubr.f32.gmra.mxu1 %v654_v14 }
 0x1c2   :  { %v836_v48 = vadd.f32 %v835_v38, %v3223_v24  ;;  %1180 = vmatprep.mubr.f32.mxu0 %v999_v2  ;;  %1374 = vmatpush1.msra.mxu0 %v3028_v51  ;;  %v1000_v46 = vmax.f32 %v834_v50, 0.0  ;;  %v313_v39 = vpop.f32.mrf.mxu0 }
 0x1c3   :  { %v839_v43 = vpop.f32.mrf.mxu1  ;;  %1181 = vmatmul.mubr.f32.gmra.mxu0 %v998_v55  ;;  %1375 = vmatprep.subr.mxu0 %v3905_v36  ;;  %v660_v45 = vmax.f32 %v313_v39, 0.0 }
 0x1c4   :  { %v1001_v3 = vmax.f32 %v836_v48, 0.0  ;;  %1376 = vmatpush1.msra.mxu0 %v3035_v5  ;;  %v840_v40 = vadd.f32 %v839_v43, %v3221_v26  ;;  %1529 = vmatprep.mubr.f32.mxu1 %v658_v42  ;;  %v315_v1 = vpop.f32.mrf.mxu0 }
 0x1c5   :  { %v841_v49 = vpop.f32.mrf.mxu1  ;;  %1377 = vmatprep.subr.mxu0 %v3905_v36  ;;  %v661_v37 = vmax.f32 %v315_v1, 0.0  ;;  %1530 = vmatmul.mubr.f32.gmra.mxu1 %v657_v0 }
 0x1c6   :  { %v842_v51 = vadd.f32 %v841_v49, %v3223_v24  ;;  %1185 = vmatprep.mubr.f32.mxu0 %v1001_v3  ;;  %1378 = vmatpush1.msra.mxu0 %v3042_v52  ;;  %v1002_v44 = vmax.f32 %v840_v40, 0.0  ;;  %v319_v28 = vpop.f32.mrf.mxu0 }
 0x1c7   :  { %v845_v61 = vpop.f32.mrf.mxu1  ;;  %1186 = vmatmul.mubr.f32.gmra.mxu0 %v1000_v46  ;;  %1379 = vmatprep.subr.mxu0 %v3905_v36  ;;  %v663_v14 = vmax.f32 %v319_v28, 0.0 }
 0x1c8   :  { %v1003_v5 = vmax.f32 %v842_v51, 0.0  ;;  %1380 = vmatpush1.msra.mxu0 %v3049_v54  ;;  %v846_v18 = vadd.f32 %v845_v61, %v3221_v26  ;;  %1534 = vmatprep.mubr.f32.mxu1 %v661_v37  ;;  %v321_v63 = vpop.f32.mrf.mxu0 }
 0x1c9   :  { %v847_v32 = vpop.f32.mrf.mxu1  ;;  %1381 = vmatprep.subr.mxu0 %v3905_v36  ;;  %v664_v34 = vmax.f32 %v321_v63, 0.0  ;;  %1535 = vmatmul.mubr.f32.gmra.mxu1 %v660_v45 }
 0x1ca   :  { %v848_v52 = vadd.f32 %v847_v32, %v3223_v24  ;;  %1190 = vmatprep.mubr.f32.mxu0 %v1003_v5  ;;  %1382 = vmatpush1.msra.mxu0 %v3058_v56  ;;  %v1004_v55 = vmax.f32 %v846_v18, 0.0  ;;  %v325_v48 = vpop.f32.mrf.mxu0 }
 0x1cb   :  { %v851_v2 = vpop.f32.mrf.mxu1  ;;  %1191 = vmatmul.mubr.f32.gmra.mxu0 %v1002_v44  ;;  %1383 = vmatprep.subr.mxu0 %v3905_v36  ;;  %v666_v40 = vmax.f32 %v325_v48, 0.0 }
 0x1cc   :  { %v1005_v54 = vmax.f32 %v848_v52, 0.0  ;;  %1384 = vmatpush1.msra.mxu0 %v3067_v7  ;;  %v852_v50 = vadd.f32 %v851_v2, %v3221_v26  ;;  %1539 = vmatprep.mubr.f32.mxu1 %v664_v34  ;;  %v327_v43 = vpop.f32.mrf.mxu0 }
 0x1cd   :  { %v853_v38 = vpop.f32.mrf.mxu1  ;;  %1385 = vmatprep.subr.mxu0 %v3905_v36  ;;  %v667_v49 = vmax.f32 %v327_v43, 0.0  ;;  %1540 = vmatmul.mubr.f32.gmra.mxu1 %v663_v14 }
 0x1ce   :  { %v854_v56 = vadd.f32 %v853_v38, %v3223_v24  ;;  %1195 = vmatprep.mubr.f32.mxu0 %v1005_v54  ;;  %1386 = vmatpush1.msra.mxu0 %v3076_v60  ;;  %v1006_v3 = vmax.f32 %v852_v50, 0.0  ;;  %v331_v0 = vpop.f32.mrf.mxu0 }
 0x1cf   :  { %v857_v30 = vpop.f32.mrf.mxu1  ;;  %1196 = vmatmul.mubr.f32.gmra.mxu0 %v1004_v55  ;;  %1387 = vmatprep.subr.mxu0 %v3905_v36  ;;  %v669_v1 = vmax.f32 %v331_v0, 0.0 }
 0x1d0   :  { %v1007_v7 = vmax.f32 %v854_v56, 0.0  ;;  %1388 = vmatpush2.msra.mxu0 %v3085_v62  ;;  %v858_v33 = vadd.f32 %v857_v30, %v3221_v26  ;;  %1544 = vmatprep.mubr.f32.mxu1 %v667_v49  ;;  %v333_v51 = vpop.f32.mrf.mxu0 }
 0x1d1   :  { %v859_v46 = vpop.f32.mrf.mxu1  ;;  %1389 = vmatprep.subr.mxu0 %v3905_v36  ;;  %v670_v44 = vmax.f32 %v333_v51, 0.0  ;;  %1545 = vmatmul.mubr.f32.gmra.mxu1 %v666_v40 }
 0x1d2   :  { %v860_v60 = vadd.f32 %v859_v46, %v3223_v24  ;;  %1200 = vmatprep.mubr.f32.mxu0 %v1007_v7  ;;  %1390 = vmatpush2.msra.mxu0 %v3094_v9  ;;  %v1008_v39 = vmax.f32 %v858_v33, 0.0  ;;  %v337_v18 = vpop.f32.mrf.mxu0 }
 0x1d3   :  { %v863_v42 = vpop.f32.mrf.mxu1  ;;  %1201 = vmatmul.mubr.f32.gmra.mxu0 %v1006_v3  ;;  %1391 = vmatprep.subr.mxu0 %v3905_v36  ;;  %v672_v2 = vmax.f32 %v337_v18, 0.0 }
 0x1d4   :  { %v1009_v62 = vmax.f32 %v860_v60, 0.0  ;;  %1392 = vmatpush2.msra.mxu0 %v3103_v20  ;;  %v864_v61 = vadd.f32 %v863_v42, %v3221_v26  ;;  %1549 = vmatprep.mubr.f32.mxu1 %v670_v44  ;;  %v339_v45 = vpop.f32.mrf.mxu0 }
 0x1d5   :  { %v865_v5 = vpop.f32.mrf.mxu1  ;;  %1393 = vmatprep.subr.mxu0 %v3905_v36  ;;  %v673_v54 = vmax.f32 %v339_v45, 0.0  ;;  %1550 = vmatmul.mubr.f32.gmra.mxu1 %v669_v1 }
 0x1d6   :  { %v866_v9 = vadd.f32 %v865_v5, %v3223_v24  ;;  %1205 = vmatprep.mubr.f32.mxu0 %v1009_v62  ;;  %1394 = vmatpush2.msra.mxu0 %v3112_v21  ;;  %v1010_v37 = vmax.f32 %v864_v61, 0.0  ;;  %v343_v63 = vpop.f32.mrf.mxu0 }
 0x1d7   :  { %v869_v32 = vpop.f32.mrf.mxu1  ;;  %1206 = vmatmul.mubr.f32.gmra.mxu0 %v1008_v39  ;;  %1395 = vmatprep.subr.mxu0 %v3905_v36  ;;  %v675_v56 = vmax.f32 %v343_v63, 0.0 }
 0x1d8   :  { %v1011_v20 = vmax.f32 %v866_v9, 0.0  ;;  %1396 = vmatpush2.msra.mxu0 %v3121_v11  ;;  %v870_v52 = vadd.f32 %v869_v32, %v3221_v26  ;;  %1554 = vmatprep.mubr.f32.mxu1 %v673_v54  ;;  %v345_v50 = vpop.f32.mrf.mxu0 }
 0x1d9   :  { %v871_v28 = vpop.f32.mrf.mxu1  ;;  %1397 = vmatprep.subr.mxu0 %v3905_v36  ;;  %v676_v48 = vmax.f32 %v345_v50, 0.0  ;;  %1555 = vmatmul.mubr.f32.gmra.mxu1 %v672_v2 }
 0x1da   :  { %v872_v21 = vadd.f32 %v871_v28, %v3223_v24  ;;  %1210 = vmatprep.mubr.f32.mxu0 %v1011_v20  ;;  %1398 = vmatpush2.msra.mxu0 %v3130_v19  ;;  %v1012_v38 = vmax.f32 %v870_v52, 0.0  ;;  %v349_v30 = vpop.f32.mrf.mxu0 }
 0x1db   :  { %v875_v55 = vpop.f32.mrf.mxu1  ;;  %1211 = vmatmul.mubr.f32.gmra.mxu0 %v1010_v37  ;;  %1399 = vmatprep.subr.mxu0 %v3905_v36  ;;  %v678_v40 = vmax.f32 %v349_v30, 0.0 }
 0x1dc   :  { %v1013_v11 = vmax.f32 %v872_v21, 0.0  ;;  %1400 = vmatpush2.msra.mxu0 %v3139_v23  ;;  %v876_v14 = vadd.f32 %v875_v55, %v3221_v26  ;;  %1559 = vmatprep.mubr.f32.mxu1 %v676_v48  ;;  %v351_v43 = vpop.f32.mrf.mxu0 }
 0x1dd   :  { %v877_v34 = vpop.f32.mrf.mxu1  ;;  %1401 = vmatprep.subr.mxu0 %v3905_v36  ;;  %v679_v49 = vmax.f32 %v351_v43, 0.0  ;;  %1560 = vmatmul.mubr.f32.gmra.mxu1 %v675_v56 }
 0x1de   :  { %v878_v19 = vadd.f32 %v877_v34, %v3223_v24  ;;  %1215 = vmatprep.mubr.f32.mxu0 %v1013_v11  ;;  %1402 = vmatpush2.msra.mxu0 %v3148_v29  ;;  %v1014_v3 = vmax.f32 %v876_v14, 0.0  ;;  %v355_v60 = vpop.f32.mrf.mxu0 }
 0x1df   :  { %v881_v7 = vpop.f32.mrf.mxu1  ;;  %1216 = vmatmul.mubr.f32.gmra.mxu0 %v1012_v38  ;;  %1403 = vmatprep.subr.mxu0 %v3905_v36  ;;  %v681_v61 = vmax.f32 %v355_v60, 0.0 }
 0x1e0   :  { %v1015_v23 = vmax.f32 %v878_v19, 0.0  ;;  %1404 = vmatpush2.msra.mxu0 %v3157_v31  ;;  %v882_v33 = vadd.f32 %v881_v7, %v3221_v26  ;;  %1564 = vmatprep.mubr.f32.mxu1 %v679_v49  ;;  %v357_v42 = vpop.f32.mrf.mxu0 }
 0x1e1   :  { %v883_v46 = vpop.f32.mrf.mxu1  ;;  %1405 = vmatprep.subr.mxu0 %v3905_v36  ;;  %v682_v5 = vmax.f32 %v357_v42, 0.0  ;;  %1565 = vmatmul.mubr.f32.gmra.mxu1 %v678_v40 }
 0x1e2   :  { %v884_v29 = vadd.f32 %v883_v46, %v3223_v24  ;;  %1220 = vmatprep.mubr.f32.mxu0 %v1015_v23  ;;  %1406 = vmatpush2.msra.mxu0 %v3166_v35  ;;  %v1016_v62 = vmax.f32 %v882_v33, 0.0  ;;  %v361_v1 = vpop.f32.mrf.mxu0 }
 0x1e3   :  { %v887_v0 = vpop.f32.mrf.mxu1  ;;  %1221 = vmatmul.mubr.f32.gmra.mxu0 %v1014_v3  ;;  %1407 = vmatprep.subr.mxu0 %v3905_v36  ;;  %v684_v45 = vmax.f32 %v361_v1, 0.0 }
 0x1e4   :  { %v1017_v31 = vmax.f32 %v884_v29, 0.0  ;;  %1408 = vmatpush2.msra.mxu0 %v3175_v41  ;;  %v888_v51 = vadd.f32 %v887_v0, %v3221_v26  ;;  %1569 = vmatprep.mubr.f32.mxu1 %v682_v5  ;;  %v363_v9 = vpop.f32.mrf.mxu0 }
 0x1e5   :  { %v889_v39 = vpop.f32.mrf.mxu1  ;;  %1409 = vmatprep.subr.mxu0 %v3905_v36  ;;  %v685_v37 = vmax.f32 %v363_v9, 0.0  ;;  %1570 = vmatmul.mubr.f32.gmra.mxu1 %v681_v61 }
 0x1e6   :  { %v890_v35 = vadd.f32 %v889_v39, %v3223_v24  ;;  %1225 = vmatprep.mubr.f32.mxu0 %v1017_v31  ;;  %1410 = vmatpush2.msra.mxu0 %v3184_v47  ;;  %v1018_v18 = vmax.f32 %v888_v51, 0.0 }
 0x1e7   :  { %v893_v44 = vpop.f32.mrf.mxu1  ;;  %1226 = vmatmul.mubr.f32.gmra.mxu0 %v1016_v62  ;;  %1411 = vmatprep.subr.mxu0 %v3905_v36 }
 0x1e8   :  { %v1019_v41 = vmax.f32 %v890_v35, 0.0  ;;  %1412 = vmatpush2.msra.mxu0 %v3193_v22  ;;  %v894_v32 = vadd.f32 %v893_v44, %v3221_v26  ;;  %1574 = vmatprep.mubr.f32.mxu1 %v685_v37 }
 0x1e9   :  { %v895_v20 = vpop.f32.mrf.mxu1  ;;  %1413 = vmatprep.subr.mxu0 %v3905_v36  ;;  %1575 = vmatmul.mubr.f32.gmra.mxu1 %v684_v45 }
 0x1ea   :  { %v896_v47 = vadd.f32 %v895_v20, %v3223_v24  ;;  %1230 = vmatprep.mubr.f32.mxu0 %v1019_v41  ;;  %1414 = vmatpush2.msra.mxu0 %v3200_v53  ;;  %v1020_v28 = vmax.f32 %v894_v32, 0.0 }
 0x1eb   :  { %v899_v52 = vpop.f32.mrf.mxu1  ;;  %1231 = vmatmul.mubr.f32.gmra.mxu0 %v1018_v18  ;;  %1415 = vmatprep.subr.mxu0 %v3905_v36 }
 0x1ec   :  { %v1021_v22 = vmax.f32 %v896_v47, 0.0  ;;  %1416 = vmatpush2.msra.mxu0 %v3207_v27  ;;  %v900_v2 = vadd.f32 %v899_v52, %v3221_v26 }
 0x1ed   :  { %v901_v54 = vpop.f32.mrf.mxu1  ;;  %1417 = vmatprep.subr.mxu0 %v3905_v36 }
 0x1ee   :  { %v902_v21 = vadd.f32 %v901_v54, %v3223_v24  ;;  %1235 = vmatprep.mubr.f32.mxu0 %v1021_v22  ;;  %1418 = vmatpush2.msra.mxu0 %v3214_v59  ;;  %v1022_v55 = vmax.f32 %v900_v2, 0.0 }
 0x1ef   :  { %v905_v53 = vpop.f32.mrf.mxu1  ;;  %1236 = vmatmul.mubr.f32.gmra.mxu0 %v1020_v28 }
 0x1f0   :  { %v1023_v63 = vmax.f32 %v902_v21, 0.0  ;;  %v906_v11 = vadd.f32 %v905_v53, %v3221_v26 }
 0x1f1   :  { %v907_v27 = vpop.f32.mrf.mxu1 }
 0x1f2   :  { %v908_v50 = vadd.f32 %v907_v27, %v3223_v24  ;;  %1240 = vmatprep.mubr.f32.mxu0 %v1023_v63  ;;  %v1024_v36 = vmax.f32 %v906_v11, 0.0 }
 0x1f3   :  { %v911_v38 = vpop.f32.mrf.mxu1  ;;  %1241 = vmatmul.mubr.f32.gmra.mxu0 %v1022_v55 }
 0x1f4   :  { %v1025_v14 = vmax.f32 %v908_v50, 0.0  ;;  %v912_v34 = vadd.f32 %v911_v38, %v3221_v26 }
 0x1f5   :  { %v913_v56 = vpop.f32.mrf.mxu1 }
 0x1f6   :  { %v914_v48 = vadd.f32 %v913_v56, %v3223_v24  ;;  %1245 = vmatprep.mubr.f32.mxu0 %v1025_v14  ;;  %v1026_v30 = vmax.f32 %v912_v34, 0.0 }
 0x1f7   :  { %v917_v59 = vpop.f32.mrf.mxu1  ;;  %1246 = vmatmul.mubr.f32.gmra.mxu0 %v1024_v36 }
 0x1f8   :  { %v1027_v19 = vmax.f32 %v914_v48, 0.0  ;;  %v918_v7 = vadd.f32 %v917_v59, %v3221_v26 }
 0x1f9   :  { %v919_v23 = vpop.f32.mrf.mxu1 }
 0x1fa   :  { %v920_v43 = vadd.f32 %v919_v23, %v3223_v24  ;;  %1250 = vmatprep.mubr.f32.mxu0 %v1027_v19  ;;  %v1028_v46 = vmax.f32 %v918_v7, 0.0 }
 0x1fb   :  { %v923_v3 = vpop.f32.mrf.mxu1  ;;  %1251 = vmatmul.mubr.f32.gmra.mxu0 %v1026_v30 }
 0x1fc   :  { %v1029_v33 = vmax.f32 %v920_v43, 0.0  ;;  %v924_v40 = vadd.f32 %v923_v3, %v3221_v26 }
 0x1fd   :  { %v925_v49 = vpop.f32.mrf.mxu1 }
 0x1fe   :  { %v926_v29 = vadd.f32 %v925_v49, %v3223_v24  ;;  %1255 = vmatprep.mubr.f32.mxu0 %v1029_v33  ;;  %v1030_v31 = vmax.f32 %v924_v40, 0.0 }
 0x1ff   :  { %v929_v60 = vpop.f32.mrf.mxu1  ;;  %1256 = vmatmul.mubr.f32.gmra.mxu0 %v1028_v46 }
 0x200   :  { %v1031_v0 = vmax.f32 %v926_v29, 0.0  ;;  %v930_v42 = vadd.f32 %v929_v60, %v3221_v26 }
 0x201   :  { %v931_v62 = vpop.f32.mrf.mxu1 }
 0x202   :  { %v932_v51 = vadd.f32 %v931_v62, %v3223_v24  ;;  %1260 = vmatprep.mubr.f32.mxu0 %v1031_v0  ;;  %v1032_v5 = vmax.f32 %v930_v42, 0.0 }
 0x203   :  { %v935_v39 = vpop.f32.mrf.mxu1  ;;  %1261 = vmatmul.mubr.f32.gmra.mxu0 %v1030_v31 }
 0x204   :  { %v1033_v61 = vmax.f32 %v932_v51, 0.0  ;;  %v936_v35 = vadd.f32 %v935_v39, %v3221_v26 }
 0x205   :  { %v937_v1 = vpop.f32.mrf.mxu1 }
 0x206   :  { %v938_v44 = vadd.f32 %v937_v1, %v3223_v24  ;;  %1265 = vmatprep.mubr.f32.mxu0 %v1033_v61  ;;  %v1034_v18 = vmax.f32 %v936_v35, 0.0 }
 0x207   :  { %v941_v41 = vpop.f32.mrf.mxu1  ;;  %1266 = vmatmul.mubr.f32.gmra.mxu0 %v1032_v5 }
 0x208   :  { %v1035_v9 = vmax.f32 %v938_v44, 0.0  ;;  %v942_v32 = vadd.f32 %v941_v41, %v3221_v26  ;;  %v592_v41 = vmax.f32 %v3062_v57, 0.0  ;;  %v600_v57 = vmax.f32 %v3107_v10, 0.0 }
 0x209   :  { %v943_v20 = vpop.f32.mrf.mxu1 }
 0x20a   :  { %v944_v45 = vadd.f32 %v943_v20, %v3223_v24  ;;  %1270 = vmatprep.mubr.f32.mxu0 %v1035_v9  ;;  %v1036_v52 = vmax.f32 %v942_v32, 0.0  ;;  %v591_v9 = vmax.f32 %v3053_v6, 0.0  ;;  %v598_v32 = vmax.f32 %v3098_v16, 0.0 }
 0x20b   :  { %v947_v37 = vpop.f32.mrf.mxu1  ;;  %1271 = vmatmul.mubr.f32.gmra.mxu0 %v1034_v18  ;;  %v595_v18 = vmax.f32 %v3080_v8, 0.0  ;;  %v601_v20 = vmax.f32 %v3116_v4, 0.0  ;;  %v604_v6 = vmax.f32 %v3134_v12, 0.0  ;;  %v603_v8 = vmax.f32 %v3125_v17, 0.0  ;;  %v3907_v4 = vld [vmem:[#allocation2_spill] sm:$0xff]  ;;  %v3909_v12 = vld [vmem:[#allocation4_spill] sm:$0xff] }
 0x20c   :  { %v1037_v47 = vmax.f32 %v944_v45, 0.0  ;;  %v948_v22 = vadd.f32 %v947_v37, %v3221_v26  ;;  %v606_v16 = vmax.f32 %v3143_v25, 0.0  ;;  %v3906_v45 = vld [vmem:[#allocation3_spill] sm:$0xff]  ;;  %v609_v37 = vmax.f32 %v3907_v4, 0.0  ;;  %v3371_v17 = vld [vmem:[%s3896_s7] ss:$0 sm:$0xff] }
 0x20d   :  { %v949_v28 = vpop.f32.mrf.mxu1 }
 0x20e   :  { %v950_v2 = vadd.f32 %v949_v28, %v3223_v24  ;;  %1275 = vmatprep.mubr.f32.mxu0 %v1037_v47  ;;  %v1038_v53 = vmax.f32 %v948_v22, 0.0  ;;  %v3908_v47 = vld [vmem:[#allocation5_spill] sm:$0xff] }
 0x20f   :  { %v953_v54 = vpop.f32.mrf.mxu1  ;;  %1276 = vmatmul.mubr.f32.gmra.mxu0 %v1036_v52  ;;  %v613_v10 = vmax.f32 %v3908_v47, 0.0  ;;  %v612_v52 = vmax.f32 %v3909_v12, 0.0 }
 0x210   :  { %v1039_v21 = vmax.f32 %v950_v2, 0.0  ;;  %v954_v63 = vadd.f32 %v953_v54, %v3221_v26 }
 0x211   :  { %v955_v55 = vpop.f32.mrf.mxu1 }
 0x212   :  { %v956_v11 = vadd.f32 %v955_v55, %v3223_v24  ;;  %1280 = vmatprep.mubr.f32.mxu0 %v1039_v21  ;;  %v1040_v38 = vmax.f32 %v954_v63, 0.0 }
 0x213   :  { %v959_v27 = vpop.f32.mrf.mxu1  ;;  %1281 = vmatmul.mubr.f32.gmra.mxu0 %v1038_v53 }
 0x214   :  { %v1041_v50 = vmax.f32 %v956_v11, 0.0  ;;  %v960_v14 = vadd.f32 %v959_v27, %v3221_v26 }
 0x215   :  { %v961_v36 = vpop.f32.mrf.mxu1 }
 0x216   :  { %v962_v34 = vadd.f32 %v961_v36, %v3223_v24  ;;  %1285 = vmatprep.mubr.f32.mxu0 %v1041_v50  ;;  %v1042_v59 = vmax.f32 %v960_v14, 0.0 }
 0x217   :  { %v965_v56 = vpop.f32.mrf.mxu1  ;;  %1286 = vmatmul.mubr.f32.gmra.mxu0 %v1040_v38 }
 0x218   :  { %v1043_v48 = vmax.f32 %v962_v34, 0.0  ;;  %v966_v19 = vadd.f32 %v965_v56, %v3221_v26 }
 0x219   :  { %v967_v30 = vpop.f32.mrf.mxu1 }
 0x21a   :  { %v968_v7 = vadd.f32 %v967_v30, %v3223_v24  ;;  %1290 = vmatprep.mubr.f32.mxu0 %v1043_v48  ;;  %v1044_v3 = vmax.f32 %v966_v19, 0.0  ;;  %v3404_v30 = vld [vmem:[%s3898_s5] ss:$0 sm:$0xff] }
 0x21b   :  { %v971_v23 = vpop.f32.mrf.mxu1  ;;  %1291 = vmatmul.mubr.f32.gmra.mxu0 %v1042_v59 }
 0x21c   :  { %v1045_v43 = vmax.f32 %v968_v7, 0.0  ;;  %v972_v33 = vadd.f32 %v971_v23, %v3221_v26 }
 0x21d   :  { %v973_v46 = vpop.f32.mrf.mxu1 }
 0x21e   :  { %v974_v40 = vadd.f32 %v973_v46, %v3223_v24  ;;  %1295 = vmatprep.mubr.f32.mxu0 %v1045_v43  ;;  %v1046_v60 = vmax.f32 %v972_v33, 0.0 }
 0x21f   :  { %v977_v49 = vpop.f32.mrf.mxu1  ;;  %1296 = vmatmul.mubr.f32.gmra.mxu0 %v1044_v3 }
 0x220   :  { %v1047_v29 = vmax.f32 %v974_v40, 0.0  ;;  %v978_v0 = vadd.f32 %v977_v49, %v3221_v26 }
 0x221   :  { %v979_v31 = vpop.f32.mrf.mxu1 }
 0x222   :  { %v980_v42 = vadd.f32 %v979_v31, %v3223_v24  ;;  %1300 = vmatprep.mubr.f32.mxu0 %v1047_v29  ;;  %v1048_v39 = vmax.f32 %v978_v0, 0.0 }
 0x223   :  { %v983_v62 = vpop.f32.mrf.mxu1  ;;  %1301 = vmatmul.mubr.f32.gmra.mxu0 %v1046_v60 }
 0x224   :  { %v1049_v51 = vmax.f32 %v980_v42, 0.0  ;;  %v984_v61 = vadd.f32 %v983_v62, %v3221_v26  ;;  %v594_v26 = vmax.f32 %v3071_v58, 0.0  ;;  %v607_v58 = vmax.f32 %v3152_v13, 0.0 }
 0x225   :  { %v985_v5 = vpop.f32.mrf.mxu1 }
 0x226   :  { %v986_v35 = vadd.f32 %v985_v5, %v3223_v24  ;;  %1305 = vmatprep.mubr.f32.mxu0 %v1049_v51  ;;  %v1050_v44 = vmax.f32 %v984_v61, 0.0  ;;  %v597_v24 = vmax.f32 %v3089_v15, 0.0  ;;  %v610_v15 = vmax.f32 %v3906_v45, 0.0 }
 0x227   :  { %1306 = vmatmul.mubr.f32.gmra.mxu0 %v1048_v39  ;;  %v1461_v13 = vpop.f32.mrf.mxu1 }
 0x228   :  { %v1051_v1 = vmax.f32 %v986_v35, 0.0  ;;  %v1462_v25 = vadd.f32 %v3371_v17, %v1461_v13 }
 0x229   :  { %v1463_v22 = vpop.f32.mrf.mxu1 }
 0x22a   :  { %1310 = vmatprep.mubr.f32.mxu0 %v1051_v1  ;;  %1908 = vst [vmem:[%s3897_s8 + $0x88] sm:$0xff] %v1462_v25 }
 0x22b   :  { %1311 = vmatmul.mubr.f32.gmra.mxu0 %v1050_v44  ;;  %v1466_v28 = vpop.f32.mrf.mxu1 }
 0x22c   :  { %1419 = vmatprep.mubr.f32.mxu0 %v592_v41  ;;  %v1467_v2 = vadd.f32 %v3371_v17, %v1466_v28 }
 0x22d   :  { %v1468_v54 = vpop.f32.mrf.mxu1 }
 0x22e   :  { %1909 = vst [vmem:[%s3897_s8 + $0x98] sm:$0xff] %v1467_v2 }
 0x22f   :  { %1420 = vmatmul.mubr.f32.vlgmr.msra.gmra.mxu0 %v591_v9  ;;  %v1471_v21 = vpop.f32.mrf.mxu1 }
 0x230   :  { %1424 = vmatprep.mubr.f32.mxu0 %v595_v18  ;;  %v1472_v53 = vadd.f32 %v3371_v17, %v1471_v21 }
 0x231   :  { %v1473_v63 = vpop.f32.mrf.mxu1 }
 0x232   :  { %1910 = vst [vmem:[%s3897_s8 + $0xa8] sm:$0xff] %v1472_v53 }
 0x233   :  { %1425 = vmatmul.mubr.f32.gmra.mxu0 %v594_v26  ;;  %v1476_v55 = vpop.f32.mrf.mxu1 }
 0x234   :  { %1429 = vmatprep.mubr.f32.mxu0 %v598_v32  ;;  %v1477_v11 = vadd.f32 %v3371_v17, %v1476_v55 }
 0x235   :  { %v1478_v27 = vpop.f32.mrf.mxu1 }
 0x236   :  { %1911 = vst [vmem:[%s3897_s8 + $0xb8] sm:$0xff] %v1477_v11 }
 0x237   :  { %1430 = vmatmul.mubr.f32.gmra.mxu0 %v597_v24  ;;  %v1481_v50 = vpop.f32.mrf.mxu1 }
 0x238   :  { %1434 = vmatprep.mubr.f32.mxu0 %v601_v20  ;;  %v1482_v38 = vadd.f32 %v3371_v17, %v1481_v50 }
 0x239   :  { %v1483_v14 = vpop.f32.mrf.mxu1 }
 0x23a   :  { %1912 = vst [vmem:[%s3897_s8 + $0xc8] sm:$0xff] %v1482_v38 }
 0x23b   :  { %1435 = vmatmul.mubr.f32.gmra.mxu0 %v600_v57  ;;  %v1486_v36 = vpop.f32.mrf.mxu1 }
 0x23c   :  { %1439 = vmatprep.mubr.f32.mxu0 %v604_v6  ;;  %v1487_v34 = vadd.f32 %v3371_v17, %v1486_v36 }
 0x23d   :  { %v1488_v56 = vpop.f32.mrf.mxu1 }
 0x23e   :  { %1913 = vst [vmem:[%s3897_s8 + $0xd8] sm:$0xff] %v1487_v34 }
 0x23f   :  { %1440 = vmatmul.mubr.f32.gmra.mxu0 %v603_v8  ;;  %v1491_v48 = vpop.f32.mrf.mxu1 }
 0x240   :  { %1444 = vmatprep.mubr.f32.mxu0 %v607_v58  ;;  %v1492_v59 = vadd.f32 %v3371_v17, %v1491_v48 }
 0x241   :  { %v1493_v19 = vpop.f32.mrf.mxu1 }
 0x242   :  { %1914 = vst [vmem:[%s3897_s8 + $0xe8] sm:$0xff] %v1492_v59 }
 0x243   :  { %1445 = vmatmul.mubr.f32.gmra.mxu0 %v606_v16  ;;  %v1496_v7 = vpop.f32.mrf.mxu1 }
 0x244   :  { %1449 = vmatprep.mubr.f32.mxu0 %v610_v15  ;;  %v1497_v23 = vadd.f32 %v3371_v17, %v1496_v7 }
 0x245   :  { %v1498_v3 = vpop.f32.mrf.mxu1 }
 0x246   :  { %1915 = vst [vmem:[%s3897_s8 + $0xf8] sm:$0xff] %v1497_v23 }
 0x247   :  { %1450 = vmatmul.mubr.f32.gmra.mxu0 %v609_v37  ;;  %v1501_v40 = vpop.f32.mrf.mxu1 }
 0x248   :  { %1454 = vmatprep.mubr.f32.mxu0 %v613_v10  ;;  %v1502_v49 = vadd.f32 %v3371_v17, %v1501_v40 }
 0x249   :  { %v1503_v60 = vpop.f32.mrf.mxu1 }
 0x24a   :  { %1916 = vst [vmem:[%s3897_s8 + $0x108] sm:$0xff] %v1502_v49 }
 0x24b   :  { %1455 = vmatmul.mubr.f32.gmra.mxu0 %v612_v52  ;;  %v1506_v42 = vpop.f32.mrf.mxu1 }
 0x24c   :  { %v1507_v62 = vadd.f32 %v3371_v17, %v1506_v42 }
 0x24d   :  { %v1508_v39 = vpop.f32.mrf.mxu1 }
 0x24e   :  { %1917 = vst [vmem:[%s3897_s8 + $0x118] sm:$0xff] %v1507_v62 }
 0x26f   :  { %v1157_v43 = vpop.f32.mrf.mxu0 }
 0x270   :  { %v3408_v33 = vadd.f32 %v3404_v30, %v1157_v43 }
 0x271   :  { %v1159_v46 = vpop.f32.mrf.mxu0 }
 0x272   :  { %1580 = vmax.xlane.f32.xlu0 %v3408_v33 }
 0x273   :  { %v1162_v29 = vpop.f32.mrf.mxu0 }
 0x274   :  { %v3416_v0 = vadd.f32 %v3404_v30, %v1162_v29 }
 0x275   :  { %v1164_v31 = vpop.f32.mrf.mxu0  ;;  %v1511_v35 = vpop.f32.mrf.mxu1 }
 0x276   :  { %1582 = vmax.xlane.f32.xlu0 %v3416_v0  ;;  %v1512_v1 = vadd.f32 %v3371_v17, %v1511_v35 }
 0x277   :  { %v1167_v51 = vpop.f32.mrf.mxu0  ;;  %v1513_v41 = vpop.f32.mrf.mxu1 }
 0x278   :  { %v3424_v61 = vadd.f32 %v3404_v30, %v1167_v51  ;;  %1918 = vst [vmem:[%s3897_s8 + $0x128] sm:$0xff] %v1512_v1 }
 0x279   :  { %v1169_v5 = vpop.f32.mrf.mxu0  ;;  %v1516_v26 = vpop.f32.mrf.mxu1 }
 0x27a   :  { %1584 = vmax.xlane.f32.xlu1 %v3424_v61  ;;  %v1517_v24 = vadd.f32 %v3371_v17, %v1516_v26 }
 0x27b   :  { %v1172_v44 = vpop.f32.mrf.mxu0  ;;  %v1518_v20 = vpop.f32.mrf.mxu1 }
 0x27c   :  { %v3432_v9 = vadd.f32 %v3404_v30, %v1172_v44  ;;  %1919 = vst [vmem:[%s3897_s8 + $0x138] sm:$0xff] %v1517_v24 }
 0x27d   :  { %v1174_v18 = vpop.f32.mrf.mxu0  ;;  %v1521_v8 = vpop.f32.mrf.mxu1 }
 0x27e   :  { %1586 = vmax.xlane.f32.xlu1 %v3432_v9  ;;  %v1522_v16 = vadd.f32 %v3371_v17, %v1521_v8 }
 0x27f   :  { %v1177_v32 = vpop.f32.mrf.mxu0  ;;  %v1523_v45 = vpop.f32.mrf.mxu1 }
 0x280   :  { %v3440_v57 = vadd.f32 %v3404_v30, %v1177_v32  ;;  %1920 = vst [vmem:[%s3897_s8 + $0x148] sm:$0xff] %v1522_v16 }
 0x281   :  { %v1179_v6 = vpop.f32.mrf.mxu0  ;;  %v1526_v37 = vpop.f32.mrf.mxu1 }
 0x282   :  { %1588 = vmax.xlane.f32.xlu0 %v3440_v57  ;;  %v1527_v10 = vadd.f32 %v3371_v17, %v1526_v37 }
 0x283   :  { %v1182_v58 = vpop.f32.mrf.mxu0  ;;  %v1528_v12 = vpop.f32.mrf.mxu1 }
 0x284   :  { %v3448_v15 = vadd.f32 %v3404_v30, %v1182_v58  ;;  %1921 = vst [vmem:[%s3897_s8 + $0x158] sm:$0xff] %v1527_v10 }
 0x285   :  { %v1184_v4 = vpop.f32.mrf.mxu0  ;;  %v1531_v25 = vpop.f32.mrf.mxu1 }
 0x286   :  { %1590 = vmax.xlane.f32.xlu1 %v3448_v15  ;;  %v1532_v28 = vadd.f32 %v3371_v17, %v1531_v25 }
 0x287   :  { %v1187_v47 = vpop.f32.mrf.mxu0  ;;  %v1533_v2 = vpop.f32.mrf.mxu1 }
 0x288   :  { %v3456_v52 = vadd.f32 %v3404_v30, %v1187_v47  ;;  %1922 = vst [vmem:[%s3897_s8 + $0x168] sm:$0xff] %v1532_v28 }
 0x289   :  { %v1189_v13 = vpop.f32.mrf.mxu0  ;;  %v1536_v53 = vpop.f32.mrf.mxu1 }
 0x28a   :  { %1592 = vmax.xlane.f32.xlu0 %v3456_v52  ;;  %v1537_v55 = vadd.f32 %v3371_v17, %v1536_v53 }
 0x28b   :  { %v1192_v22 = vpop.f32.mrf.mxu0  ;;  %v1538_v11 = vpop.f32.mrf.mxu1 }
 0x28c   :  { %v3464_v54 = vadd.f32 %v3404_v30, %v1192_v22  ;;  %1923 = vst [vmem:[%s3897_s8 + $0x178] sm:$0xff] %v1537_v55 }
 0x28d   :  { %v1194_v21 = vpop.f32.mrf.mxu0  ;;  %v1541_v38 = vpop.f32.mrf.mxu1 }
 0x28e   :  { %1594 = vmax.xlane.f32.xlu1 %v3464_v54  ;;  %v1542_v36 = vadd.f32 %v3371_v17, %v1541_v38 }
 0x28f   :  { %v1197_v63 = vpop.f32.mrf.mxu0  ;;  %v1543_v34 = vpop.f32.mrf.mxu1 }
 0x290   :  { %v3472_v27 = vadd.f32 %v3404_v30, %v1197_v63  ;;  %1924 = vst [vmem:[%s3897_s8 + $0x188] sm:$0xff] %v1542_v36 }
 0x291   :  { %v1199_v50 = vpop.f32.mrf.mxu0  ;;  %v1546_v59 = vpop.f32.mrf.mxu1 }
 0x292   :  { %1596 = vmax.xlane.f32.xlu0 %v3472_v27  ;;  %v1547_v7 = vadd.f32 %v3371_v17, %v1546_v59 }
 0x293   :  { %v1202_v14 = vpop.f32.mrf.mxu0  ;;  %v1548_v23 = vpop.f32.mrf.mxu1 }
 0x294   :  { %v3480_v56 = vadd.f32 %v3404_v30, %v1202_v14  ;;  %1925 = vst [vmem:[%s3897_s8 + $0x198] sm:$0xff] %v1547_v7 }
 0x295   :  { %v1204_v48 = vpop.f32.mrf.mxu0  ;;  %v1551_v46 = vpop.f32.mrf.mxu1 }
 0x296   :  { %1598 = vmax.xlane.f32.xlu1 %v3480_v56  ;;  %v1552_v49 = vadd.f32 %v3371_v17, %v1551_v46 }
 0x297   :  { %v1207_v19 = vpop.f32.mrf.mxu0  ;;  %v1553_v29 = vpop.f32.mrf.mxu1 }
 0x298   :  { %v3488_v43 = vadd.f32 %v3404_v30, %v1207_v19  ;;  %1926 = vst [vmem:[%s3897_s8 + $0x1a8] sm:$0xff] %v1552_v49 }
 0x299   :  { %v1209_v3 = vpop.f32.mrf.mxu0  ;;  %v1556_v42 = vpop.f32.mrf.mxu1 }
 0x29a   :  { %1600 = vmax.xlane.f32.xlu0 %v3488_v43  ;;  %v1557_v51 = vadd.f32 %v3371_v17, %v1556_v42 }
 0x29b   :  { %v1212_v40 = vpop.f32.mrf.mxu0  ;;  %v1558_v39 = vpop.f32.mrf.mxu1 }
 0x29c   :  { %v3496_v60 = vadd.f32 %v3404_v30, %v1212_v40  ;;  %1927 = vst [vmem:[%s3897_s8 + $0x1b8] sm:$0xff] %v1557_v51 }
 0x29d   :  { %v1214_v31 = vpop.f32.mrf.mxu0  ;;  %v1561_v1 = vpop.f32.mrf.mxu1 }
 0x29e   :  { %1602 = vmax.xlane.f32.xlu1 %v3496_v60  ;;  %v1562_v41 = vadd.f32 %v3371_v17, %v1561_v1 }
 0x29f   :  { %v1217_v62 = vpop.f32.mrf.mxu0  ;;  %v1563_v18 = vpop.f32.mrf.mxu1 }
 0x2a0   :  { %v3504_v5 = vadd.f32 %v3404_v30, %v1217_v62  ;;  %1928 = vst [vmem:[%s3897_s8 + $0x1c8] sm:$0xff] %v1562_v41 }
 0x2a1   :  { %v1219_v35 = vpop.f32.mrf.mxu0  ;;  %v1566_v24 = vpop.f32.mrf.mxu1 }
 0x2a2   :  { %1604 = vmax.xlane.f32.xlu0 %v3504_v5  ;;  %v1567_v6 = vadd.f32 %v3371_v17, %v1566_v24 }
 0x2a3   :  { %v1222_v44 = vpop.f32.mrf.mxu0  ;;  %v1568_v8 = vpop.f32.mrf.mxu1 }
 0x2a4   :  { %v3512_v26 = vadd.f32 %v3404_v30, %v1222_v44  ;;  %1929 = vst [vmem:[%s3897_s8 + $0x1d8] sm:$0xff] %v1567_v6 }
 0x2a5   :  { %v1224_v32 = vpop.f32.mrf.mxu0  ;;  %v1571_v45 = vpop.f32.mrf.mxu1 }
 0x2a6   :  { %1606 = vmax.xlane.f32.xlu1 %v3512_v26  ;;  %v1572_v37 = vadd.f32 %v3371_v17, %v1571_v45 }
 0x2a7   :  { %v1227_v20 = vpop.f32.mrf.mxu0  ;;  %v1573_v47 = vpop.f32.mrf.mxu1 }
 0x2a8   :  { %v3520_v58 = vadd.f32 %v3404_v30, %v1227_v20  ;;  %1930 = vst [vmem:[%s3897_s8 + $0x1e8] sm:$0xff] %v1572_v37 }
 0x2a9   :  { %v1229_v16 = vpop.f32.mrf.mxu0  ;;  %v1576_v13 = vpop.f32.mrf.mxu1 }
 0x2aa   :  { %1608 = vmax.xlane.f32.xlu0 %v3520_v58  ;;  %v1577_v22 = vadd.f32 %v3371_v17, %v1576_v13 }
 0x2ab   :  { %v1232_v4 = vpop.f32.mrf.mxu0  ;;  %v1578_v28 = vpop.f32.mrf.mxu1 }
 0x2ac   :  { %v3528_v10 = vadd.f32 %v3404_v30, %v1232_v4  ;;  %1931 = vst [vmem:[%s3897_s8 + $0x1f8] sm:$0xff] %v1577_v22 }
 0x2ad   :  { %v1234_v12 = vpop.f32.mrf.mxu0 }
 0x2ae   :  { %1610 = vmax.xlane.f32.xlu1 %v3528_v10 }
 0x2af   :  { %v1237_v25 = vpop.f32.mrf.mxu0 }
 0x2b0   :  { %v3536_v2 = vadd.f32 %v3404_v30, %v1237_v25 }
 0x2b1   :  { %v1239_v21 = vpop.f32.mrf.mxu0 }
 0x2b2   :  { %1612 = vmax.xlane.f32.xlu0 %v3536_v2 }
 0x2b3   :  { %v1242_v53 = vpop.f32.mrf.mxu0 }
 0x2b4   :  { %v3543_v63 = vadd.f32 %v3404_v30, %v1242_v53 }
 0x2b5   :  { %v1244_v55 = vpop.f32.mrf.mxu0 }
 0x2b6   :  { %1614 = vmax.xlane.f32.xlu1 %v3543_v63 }
 0x2b7   :  { %v1247_v11 = vpop.f32.mrf.mxu0 }
 0x2b8   :  { %v3547_v50 = vadd.f32 %v3404_v30, %v1247_v11 }
 0x2b9   :  { %v1249_v38 = vpop.f32.mrf.mxu0 }
 0x2ba   :  { %1616 = vmax.xlane.f32.xlu0 %v3547_v50 }
 0x2bb   :  { %v1252_v14 = vpop.f32.mrf.mxu0 }
 0x2bc   :  { %v3551_v36 = vadd.f32 %v3404_v30, %v1252_v14 }
 0x2bd   :  { %v1254_v34 = vpop.f32.mrf.mxu0 }
 0x2be   :  { %1618 = vmax.xlane.f32.xlu1 %v3551_v36 }
 0x2bf   :  { %v1257_v48 = vpop.f32.mrf.mxu0 }
 0x2c0   :  { %v3555_v59 = vadd.f32 %v3404_v30, %v1257_v48 }
 0x2c1   :  { %v1259_v19 = vpop.f32.mrf.mxu0 }
 0x2c2   :  { %1620 = vmax.xlane.f32.xlu0 %v3555_v59 }
 0x2c3   :  { %v1262_v7 = vpop.f32.mrf.mxu0 }
 0x2c4   :  { %v3559_v23 = vadd.f32 %v3404_v30, %v1262_v7 }
 0x2c5   :  { %v1264_v3 = vpop.f32.mrf.mxu0 }
 0x2c6   :  { %1622 = vmax.xlane.f32.xlu1 %v3559_v23 }
 0x2c7   :  { %v1267_v46 = vpop.f32.mrf.mxu0 }
 0x2c8   :  { %v3563_v40 = vadd.f32 %v3404_v30, %v1267_v46 }
 0x2c9   :  { %v1269_v49 = vpop.f32.mrf.mxu0 }
 0x2ca   :  { %1624 = vmax.xlane.f32.xlu0 %v3563_v40 }
 0x2cb   :  { %v1272_v29 = vpop.f32.mrf.mxu0 }
 0x2cc   :  { %v3567_v31 = vadd.f32 %v3404_v30, %v1272_v29 }
 0x2cd   :  { %v1274_v42 = vpop.f32.mrf.mxu0 }
 0x2ce   :  { %1626 = vmax.xlane.f32.xlu1 %v3567_v31 }
 0x2cf   :  { %v1277_v62 = vpop.f32.mrf.mxu0 }
 0x2d0   :  { %v3571_v51 = vadd.f32 %v3404_v30, %v1277_v62 }
 0x2d1   :  { %v1279_v39 = vpop.f32.mrf.mxu0 }
 0x2d2   :  { %1628 = vmax.xlane.f32.xlu0 %v3571_v51 }
 0x2d3   :  { %v1282_v35 = vpop.f32.mrf.mxu0 }
 0x2d4   :  { %v3575_v1 = vadd.f32 %v3404_v30, %v1282_v35 }
 0x2d5   :  { %v1284_v44 = vpop.f32.mrf.mxu0 }
 0x2d6   :  { %1630 = vmax.xlane.f32.xlu1 %v3575_v1 }
 0x2d7   :  { %v1287_v41 = vpop.f32.mrf.mxu0 }
 0x2d8   :  { %v3579_v18 = vadd.f32 %v3404_v30, %v1287_v41 }
 0x2d9   :  { %v1289_v32 = vpop.f32.mrf.mxu0 }
 0x2da   :  { %1632 = vmax.xlane.f32.xlu0 %v3579_v18 }
 0x2db   :  { %v1292_v24 = vpop.f32.mrf.mxu0 }
 0x2dc   :  { %v3583_v20 = vadd.f32 %v3404_v30, %v1292_v24 }
 0x2dd   :  { %v1294_v6 = vpop.f32.mrf.mxu0 }
 0x2de   :  { %1634 = vmax.xlane.f32.xlu1 %v3583_v20 }
 0x2df   :  { %v1297_v8 = vpop.f32.mrf.mxu0 }
 0x2e0   :  { %v3587_v16 = vadd.f32 %v3404_v30, %v1297_v8 }
 0x2e1   :  { %v1299_v45 = vpop.f32.mrf.mxu0 }
 0x2e2   :  { %1636 = vmax.xlane.f32.xlu0 %v3587_v16 }
 0x2e3   :  { %v1302_v4 = vpop.f32.mrf.mxu0 }
 0x2e4   :  { %v3591_v37 = vadd.f32 %v3404_v30, %v1302_v4 }
 0x2e5   :  { %v1304_v47 = vpop.f32.mrf.mxu0 }
 0x2e6   :  { %1638 = vmax.xlane.f32.xlu1 %v3591_v37 }
 0x2e7   :  { %v1307_v12 = vpop.f32.mrf.mxu0 }
 0x2e8   :  { %v3595_v13 = vadd.f32 %v3404_v30, %v1307_v12 }
 0x2e9   :  { %v1309_v25 = vpop.f32.mrf.mxu0 }
 0x2ea   :  { %1640 = vmax.xlane.f32.xlu0 %v3595_v13 }
 0x2eb   :  { %v1312_v22 = vpop.f32.mrf.mxu0 }
 0x2ec   :  { %v3599_v28 = vadd.f32 %v3404_v30, %v1312_v22 }
 0x2ed   :  { %v1314_v21 = vpop.f32.mrf.mxu0 }
 0x2ee   :  { %1642 = vmax.xlane.f32.xlu1 %v3599_v28 }
 0x2ef   :  { %v1421_v53 = vpop.f32.mrf.mxu0 }
 0x2f0   :  { %v1422_v55 = vadd.f32 %v3371_v17, %v1421_v53 }
 0x2f1   :  { %v1423_v11 = vpop.f32.mrf.mxu0 }
 0x2f2   :  { %1900 = vst [vmem:[%s3897_s8 + $0x8] sm:$0xff] %v1422_v55 }
 0x2f3   :  { %v1426_v38 = vpop.f32.mrf.mxu0 }
 0x2f4   :  { %v1427_v14 = vadd.f32 %v3371_v17, %v1426_v38 }
 0x2f5   :  { %v1428_v34 = vpop.f32.mrf.mxu0 }
 0x2f6   :  { %1901 = vst [vmem:[%s3897_s8 + $0x18] sm:$0xff] %v1427_v14 }
 0x2f7   :  { %v1431_v30 = vpop.f32.mrf.mxu0 }
 0x2f8   :  { %v1432_v48 = vadd.f32 %v3371_v17, %v1431_v30 }
 0x2f9   :  { %v1433_v19 = vpop.f32.mrf.mxu0 }
 0x2fa   :  { %1902 = vst [vmem:[%s3897_s8 + $0x28] sm:$0xff] %v1432_v48 }
 0x2fb   :  { %v1436_v7 = vpop.f32.mrf.mxu0  ;;  %v1581_v3 = vpop.xlane.xlu0 %1580 }
 0x2fc   :  { %v1437_v46 = vadd.f32 %v3371_v17, %v1436_v7  ;;  %v1644_v49 = vsub.f32 %v3408_v33, %v1581_v3 }
 0x2fd   :  { %v1438_v29 = vpop.f32.mrf.mxu0 }
 0x2fe   :  { %1903 = vst [vmem:[%s3897_s8 + $0x38] sm:$0xff] %v1437_v46  ;;  %v1676_v42 = vmul.f32 1.442695, %v1644_v49 }
 0x2ff   :  { %v1441_v62 = vpop.f32.mrf.mxu0  ;;  %v1583_v39 = vpop.xlane.xlu0 %1582 }
 0x300   :  { %2131 = vpow2.f32 %v1676_v42  ;;  %v1442_v35 = vadd.f32 %v3371_v17, %v1441_v62  ;;  %v1645_v44 = vsub.f32 %v3416_v0, %v1583_v39 }
 0x301   :  { %v1443_v41 = vpop.f32.mrf.mxu0 }
 0x302   :  { %1904 = vst [vmem:[%s3897_s8 + $0x48] sm:$0xff] %v1442_v35  ;;  %v1678_v32 = vmul.f32 1.442695, %v1645_v44 }
 0x303   :  { %v1446_v33 = vpop.f32.mrf.mxu0  ;;  %v1585_v24 = vpop.xlane.xlu1 %1584 }
 0x304   :  { %2133 = vpow2.f32 %v1678_v32  ;;  %v1447_v6 = vadd.f32 %v3371_v17, %v1446_v33  ;;  %v1646_v8 = vsub.f32 %v3424_v61, %v1585_v24 }
 0x305   :  { %v1448_v45 = vpop.f32.mrf.mxu0 }
 0x306   :  { %1905 = vst [vmem:[%s3897_s8 + $0x58] sm:$0xff] %v1447_v6  ;;  %v1680_v4 = vmul.f32 1.442695, %v1646_v8 }
 0x307   :  { %v1451_v0 = vpop.f32.mrf.mxu0  ;;  %v1587_v47 = vpop.xlane.xlu1 %1586 }
 0x308   :  { %2135 = vpow2.f32 %v1680_v4  ;;  %v1452_v12 = vadd.f32 %v3371_v17, %v1451_v0  ;;  %v1647_v25 = vsub.f32 %v3432_v9, %v1587_v47 }
 0x309   :  { %v1453_v22 = vpop.f32.mrf.mxu0 }
 0x30a   :  { %1906 = vst [vmem:[%s3897_s8 + $0x68] sm:$0xff] %v1452_v12  ;;  %v1682_v21 = vmul.f32 1.442695, %v1647_v25 }
 0x30b   :  { %v1456_v61 = vpop.f32.mrf.mxu0  ;;  %v1589_v53 = vpop.xlane.xlu0 %1588 }
 0x30c   :  { %2137 = vpow2.f32 %v1682_v21  ;;  %v1457_v55 = vadd.f32 %v3371_v17, %v1456_v61  ;;  %v1648_v11 = vsub.f32 %v3440_v57, %v1589_v53 }
 0x30d   :  { %v3636_v38 = vpop.eup %2131  ;;  %v1458_v14 = vpop.f32.mrf.mxu0 }
 0x30e   :  { %1907 = vst [vmem:[%s3897_s8 + $0x78] sm:$0xff] %v1457_v55  ;;  %v1684_v9 = vmul.f32 1.442695, %v1648_v11  ;;  %1740 = vadd.xlane.f32.xlu0 %v3636_v38 }
 0x30f   :  { %v1591_v34 = vpop.xlane.xlu1 %1590 }
 0x310   :  { %2139 = vpow2.f32 %v1684_v9  ;;  %v1649_v30 = vsub.f32 %v3448_v15, %v1591_v34 }
 0x311   :  { %v3643_v48 = vpop.eup %2133 }
 0x312   :  { %v1686_v19 = vmul.f32 1.442695, %v1649_v30  ;;  %1742 = vadd.xlane.f32.xlu1 %v3643_v48 }
 0x313   :  { %v1593_v17 = vpop.xlane.xlu0 %1592 }
 0x314   :  { %2141 = vpow2.f32 %v1686_v19  ;;  %v1650_v57 = vsub.f32 %v3456_v52, %v1593_v17 }
 0x315   :  { %v3647_v7 = vpop.eup %2135 }
 0x316   :  { %v1688_v3 = vmul.f32 1.442695, %v1650_v57  ;;  %1744 = vadd.xlane.f32.xlu0 %v3647_v7 }
 0x317   :  { %v1595_v46 = vpop.xlane.xlu1 %1594 }
 0x318   :  { %2143 = vpow2.f32 %v1688_v3  ;;  %v1651_v49 = vsub.f32 %v3464_v54, %v1595_v46 }
 0x319   :  { %v3651_v29 = vpop.eup %2137 }
 0x31a   :  { %v1690_v15 = vmul.f32 1.442695, %v1651_v49  ;;  %1746 = vadd.xlane.f32.xlu1 %v3651_v29 }
 0x31b   :  { %v1597_v42 = vpop.xlane.xlu0 %1596 }
 0x31c   :  { %2145 = vpow2.f32 %v1690_v15  ;;  %v1652_v62 = vsub.f32 %v3472_v27, %v1597_v42 }
 0x31d   :  { %v3655_v39 = vpop.eup %2139 }
 0x31e   :  { %v1692_v52 = vmul.f32 1.442695, %v1652_v62  ;;  %1748 = vadd.xlane.f32.xlu0 %v3655_v39 }
 0x31f   :  { %v1599_v35 = vpop.xlane.xlu1 %1598 }
 0x320   :  { %2147 = vpow2.f32 %v1692_v52  ;;  %v1653_v44 = vsub.f32 %v3480_v56, %v1599_v35 }
 0x321   :  { %v3659_v41 = vpop.eup %2141 }
 0x322   :  { %v1694_v54 = vmul.f32 1.442695, %v1653_v44  ;;  %1750 = vadd.xlane.f32.xlu1 %v3659_v41 }
 0x323   :  { %v1601_v32 = vpop.xlane.xlu0 %1600 }
 0x324   :  { %2149 = vpow2.f32 %v1694_v54  ;;  %v1654_v33 = vsub.f32 %v3488_v43, %v1601_v32 }
 0x325   :  { %v3663_v24 = vpop.eup %2143 }
 0x326   :  { %v1696_v27 = vmul.f32 1.442695, %v1654_v33  ;;  %1752 = vadd.xlane.f32.xlu0 %v3663_v24 }
 0x327   :  { %v1603_v6 = vpop.xlane.xlu1 %1602 }
 0x328   :  { %2151 = vpow2.f32 %v1696_v27  ;;  %v1655_v8 = vsub.f32 %v3496_v60, %v1603_v6 }
 0x329   :  { %v3667_v45 = vpop.eup %2145 }
 0x32a   :  { %v1698_v56 = vmul.f32 1.442695, %v1655_v8  ;;  %1754 = vadd.xlane.f32.xlu1 %v3667_v45 }
 0x32b   :  { %v1605_v4 = vpop.xlane.xlu0 %1604 }
 0x32c   :  { %2153 = vpow2.f32 %v1698_v56  ;;  %v1656_v0 = vsub.f32 %v3504_v5, %v1605_v4 }
 0x32d   :  { %v3671_v47 = vpop.eup %2147 }
 0x32e   :  { %v1700_v43 = vmul.f32 1.442695, %v1656_v0  ;;  %1756 = vadd.xlane.f32.xlu0 %v3671_v47 }
 0x32f   :  { %v1607_v12 = vpop.xlane.xlu1 %1606 }
 0x330   :  { %2155 = vpow2.f32 %v1700_v43  ;;  %v1657_v25 = vsub.f32 %v3512_v26, %v1607_v12 }
 0x331   :  { %v3675_v22 = vpop.eup %2149 }
 0x332   :  { %v1702_v60 = vmul.f32 1.442695, %v1657_v25  ;;  %1758 = vadd.xlane.f32.xlu1 %v3675_v22 }
 0x333   :  { %v1609_v21 = vpop.xlane.xlu0 %1608 }
 0x334   :  { %2157 = vpow2.f32 %v1702_v60  ;;  %v1658_v61 = vsub.f32 %v3520_v58, %v1609_v21 }
 0x335   :  { %v3679_v53 = vpop.eup %2151 }
 0x336   :  { %v1704_v5 = vmul.f32 1.442695, %v1658_v61  ;;  %1760 = vadd.xlane.f32.xlu0 %v3679_v53 }
 0x337   :  { %v1611_v55 = vpop.xlane.xlu1 %1610 }
 0x338   :  { %2159 = vpow2.f32 %v1704_v5  ;;  %v1659_v11 = vsub.f32 %v3528_v10, %v1611_v55 }
 0x339   :  { %v3683_v14 = vpop.eup %2153 }
 0x33a   :  { %v1706_v26 = vmul.f32 1.442695, %v1659_v11  ;;  %1762 = vadd.xlane.f32.xlu1 %v3683_v14 }
 0x33b   :  { %v1613_v9 = vpop.xlane.xlu0 %1612 }
 0x33c   :  { %2161 = vpow2.f32 %v1706_v26  ;;  %v1660_v34 = vsub.f32 %v3536_v2, %v1613_v9 }
 0x33d   :  { %v3687_v30 = vpop.eup %2155 }
 0x33e   :  { %v1708_v58 = vmul.f32 1.442695, %v1660_v34  ;;  %1764 = vadd.xlane.f32.xlu0 %v3687_v30 }
 0x33f   :  { %v1615_v19 = vpop.xlane.xlu1 %1614 }
 0x340   :  { %2163 = vpow2.f32 %v1708_v58  ;;  %v1661_v17 = vsub.f32 %v3543_v63, %v1615_v19 }
 0x341   :  { %v3691_v57 = vpop.eup %2157 }
 0x342   :  { %v1710_v10 = vmul.f32 1.442695, %v1661_v17  ;;  %1766 = vadd.xlane.f32.xlu1 %v3691_v57 }
 0x343   :  { %v1617_v3 = vpop.xlane.xlu0 %1616 }
 0x344   :  { %2165 = vpow2.f32 %v1710_v10  ;;  %v1662_v46 = vsub.f32 %v3547_v50, %v1617_v3 }
 0x345   :  { %v3695_v49 = vpop.eup %2159 }
 0x346   :  { %v1712_v2 = vmul.f32 1.442695, %v1662_v46  ;;  %1768 = vadd.xlane.f32.xlu0 %v3695_v49 }
 0x347   :  { %v1619_v15 = vpop.xlane.xlu1 %1618 }
 0x348   :  { %2167 = vpow2.f32 %v1712_v2  ;;  %v1663_v42 = vsub.f32 %v3551_v36, %v1619_v15 }
 0x349   :  { %v3699_v62 = vpop.eup %2161 }
 0x34a   :  { %v1714_v63 = vmul.f32 1.442695, %v1663_v42  ;;  %1770 = vadd.xlane.f32.xlu1 %v3699_v62 }
 0x34b   :  { %v1621_v52 = vpop.xlane.xlu0 %1620 }
 0x34c   :  { %2169 = vpow2.f32 %v1714_v63  ;;  %v1664_v35 = vsub.f32 %v3555_v59, %v1621_v52 }
 0x34d   :  { %v3703_v44 = vpop.eup %2163 }
 0x34e   :  { %v1716_v50 = vmul.f32 1.442695, %v1664_v35  ;;  %1772 = vadd.xlane.f32.xlu0 %v3703_v44 }
 0x34f   :  { %v1623_v54 = vpop.xlane.xlu1 %1622 }
 0x350   :  { %2171 = vpow2.f32 %v1716_v50  ;;  %v1665_v32 = vsub.f32 %v3559_v23, %v1623_v54 }
 0x351   :  { %v3707_v33 = vpop.eup %2165 }
 0x352   :  { %v1718_v36 = vmul.f32 1.442695, %v1665_v32  ;;  %1774 = vadd.xlane.f32.xlu1 %v3707_v33 }
 0x353   :  { %v1625_v27 = vpop.xlane.xlu0 %1624 }
 0x354   :  { %2173 = vpow2.f32 %v1718_v36  ;;  %v1666_v6 = vsub.f32 %v3563_v40, %v1625_v27 }
 0x355   :  { %v3711_v8 = vpop.eup %2167 }
 0x356   :  { %v1720_v59 = vmul.f32 1.442695, %v1666_v6  ;;  %1776 = vadd.xlane.f32.xlu0 %v3711_v8 }
 0x357   :  { %v1627_v56 = vpop.xlane.xlu1 %1626 }
 0x358   :  { %2175 = vpow2.f32 %v1720_v59  ;;  %v1667_v4 = vsub.f32 %v3567_v31, %v1627_v56 }
 0x359   :  { %v3715_v0 = vpop.eup %2169 }
 0x35a   :  { %v1722_v23 = vmul.f32 1.442695, %v1667_v4  ;;  %1778 = vadd.xlane.f32.xlu1 %v3715_v0 }
 0x35b   :  { %v1629_v43 = vpop.xlane.xlu0 %1628 }
 0x35c   :  { %2177 = vpow2.f32 %v1722_v23  ;;  %v1668_v12 = vsub.f32 %v3571_v51, %v1629_v43 }
 0x35d   :  { %v3719_v25 = vpop.eup %2171 }
 0x35e   :  { %v1724_v40 = vmul.f32 1.442695, %v1668_v12  ;;  %1780 = vadd.xlane.f32.xlu0 %v3719_v25 }
 0x35f   :  { %v1631_v60 = vpop.xlane.xlu1 %1630 }
 0x360   :  { %2179 = vpow2.f32 %v1724_v40  ;;  %v1669_v21 = vsub.f32 %v3575_v1, %v1631_v60 }
 0x361   :  { %v3723_v61 = vpop.eup %2173 }
 0x362   :  { %v1726_v31 = vmul.f32 1.442695, %v1669_v21  ;;  %1782 = vadd.xlane.f32.xlu1 %v3723_v61 }
 0x363   :  { %v1633_v5 = vpop.xlane.xlu0 %1632 }
 0x364   :  { %2181 = vpow2.f32 %v1726_v31  ;;  %v1670_v55 = vsub.f32 %v3579_v18, %v1633_v5 }
 0x365   :  { %v3727_v11 = vpop.eup %2175 }
 0x366   :  { %v1728_v51 = vmul.f32 1.442695, %v1670_v55  ;;  %1784 = vadd.xlane.f32.xlu0 %v3727_v11 }
 0x367   :  { %v1635_v26 = vpop.xlane.xlu1 %1634 }
 0x368   :  { %2183 = vpow2.f32 %v1728_v51  ;;  %v1671_v9 = vsub.f32 %v3583_v20, %v1635_v26 }
 0x369   :  { %v3731_v34 = vpop.eup %2177 }
 0x36a   :  { %v1730_v1 = vmul.f32 1.442695, %v1671_v9  ;;  %1786 = vadd.xlane.f32.xlu1 %v3731_v34 }
 0x36b   :  { %v1637_v58 = vpop.xlane.xlu0 %1636 }
 0x36c   :  { %2185 = vpow2.f32 %v1730_v1  ;;  %v1672_v19 = vsub.f32 %v3587_v16, %v1637_v58 }
 0x36d   :  { %v3735_v17 = vpop.eup %2179 }
 0x36e   :  { %v1732_v18 = vmul.f32 1.442695, %v1672_v19  ;;  %1788 = vadd.xlane.f32.xlu0 %v3735_v17 }
 0x36f   :  { %v1639_v10 = vpop.xlane.xlu1 %1638 }
 0x370   :  { %2187 = vpow2.f32 %v1732_v18  ;;  %v1673_v3 = vsub.f32 %v3591_v37, %v1639_v10 }
 0x371   :  { %v3739_v46 = vpop.eup %2181 }
 0x372   :  { %v1734_v20 = vmul.f32 1.442695, %v1673_v3  ;;  %1790 = vadd.xlane.f32.xlu1 %v3739_v46 }
 0x373   :  { %v1641_v2 = vpop.xlane.xlu0 %1640 }
 0x374   :  { %2189 = vpow2.f32 %v1734_v20  ;;  %v1674_v15 = vsub.f32 %v3595_v13, %v1641_v2 }
 0x375   :  { %v3743_v42 = vpop.eup %2183 }
 0x376   :  { %v1736_v16 = vmul.f32 1.442695, %v1674_v15  ;;  %1792 = vadd.xlane.f32.xlu0 %v3743_v42 }
 0x377   :  { %v1643_v63 = vpop.xlane.xlu1 %1642 }
 0x378   :  { %2191 = vpow2.f32 %v1736_v16  ;;  %v1675_v52 = vsub.f32 %v3599_v28, %v1643_v63 }
 0x379   :  { %v3747_v35 = vpop.eup %2185 }
 0x37a   :  { %v1738_v37 = vmul.f32 1.442695, %v1675_v52  ;;  %1794 = vadd.xlane.f32.xlu1 %v3747_v35 }
 0x37c   :  { %2193 = vpow2.f32 %v1738_v37 }
 0x37d   :  { %v3750_v50 = vpop.eup %2187 }
 0x37e   :  { %1796 = vadd.xlane.f32.xlu0 %v3750_v50 }
 0x381   :  { %v3753_v13 = vpop.eup %2189 }
 0x382   :  { %1798 = vadd.xlane.f32.xlu1 %v3753_v13 }
 0x385   :  { %v3756_v54 = vpop.eup %2191 }
 0x386   :  { %1800 = vadd.xlane.f32.xlu0 %v3756_v54 }
 0x389   :  { %v3759_v32 = vpop.eup %2193 }
 0x38a   :  { %1802 = vadd.xlane.f32.xlu1 %v3759_v32 }
 0x397   :  { %v1741_v28 = vpop.xlane.xlu0 %1740 }
 0x398   :  { %2195 = vrcp.f32 %v1741_v28 }
 0x39b   :  { %v1743_v36 = vpop.xlane.xlu1 %1742 }
 0x39c   :  { %2197 = vrcp.f32 %v1743_v36 }
 0x39f   :  { %v1745_v27 = vpop.xlane.xlu0 %1744 }
 0x3a0   :  { %2199 = vrcp.f32 %v1745_v27 }
 0x3a3   :  { %v1747_v6 = vpop.xlane.xlu1 %1746 }
 0x3a4   :  { %2201 = vrcp.f32 %v1747_v6 }
 0x3a5   :  { %v2196_v59 = vpop.eup %2195 }
 0x3a6   :  { %v1805_v56 = vmul.f32 %v2196_v59, %v3636_v38 }
 0x3a7   :  { %v1749_v4 = vpop.xlane.xlu0 %1748 }
 0x3a8   :  { %1868 = vst [vmem:[%s3897_s8] sm:$0xff] %v1805_v56  ;;  %2203 = vrcp.f32 %v1749_v4 }
 0x3a9   :  { %v2198_v23 = vpop.eup %2197 }
 0x3aa   :  { %v1807_v43 = vmul.f32 %v2198_v23, %v3643_v48 }
 0x3ab   :  { %v1751_v12 = vpop.xlane.xlu1 %1750 }
 0x3ac   :  { %1869 = vst [vmem:[%s3897_s8 + $0x10] sm:$0xff] %v1807_v43  ;;  %2205 = vrcp.f32 %v1751_v12 }
 0x3ad   :  { %v2200_v40 = vpop.eup %2199 }
 0x3ae   :  { %v1809_v60 = vmul.f32 %v2200_v40, %v3647_v7 }
 0x3af   :  { %v1753_v21 = vpop.xlane.xlu0 %1752 }
 0x3b0   :  { %1870 = vst [vmem:[%s3897_s8 + $0x20] sm:$0xff] %v1809_v60  ;;  %2207 = vrcp.f32 %v1753_v21 }
 0x3b1   :  { %v2202_v38 = vpop.eup %2201 }
 0x3b2   :  { %v1811_v31 = vmul.f32 %v2202_v38, %v3651_v29 }
 0x3b3   :  { %v1755_v5 = vpop.xlane.xlu1 %1754 }
 0x3b4   :  { %1871 = vst [vmem:[%s3897_s8 + $0x30] sm:$0xff] %v1811_v31  ;;  %2209 = vrcp.f32 %v1755_v5 }
 0x3b5   :  { %v2204_v48 = vpop.eup %2203 }
 0x3b6   :  { %v1813_v55 = vmul.f32 %v2204_v48, %v3655_v39 }
 0x3b7   :  { %v1757_v51 = vpop.xlane.xlu0 %1756 }
 0x3b8   :  { %1872 = vst [vmem:[%s3897_s8 + $0x40] sm:$0xff] %v1813_v55  ;;  %2211 = vrcp.f32 %v1757_v51 }
 0x3b9   :  { %v2206_v7 = vpop.eup %2205 }
 0x3ba   :  { %v1815_v26 = vmul.f32 %v2206_v7, %v3659_v41 }
 0x3bb   :  { %v1759_v9 = vpop.xlane.xlu1 %1758 }
 0x3bc   :  { %1873 = vst [vmem:[%s3897_s8 + $0x50] sm:$0xff] %v1815_v26  ;;  %2213 = vrcp.f32 %v1759_v9 }
 0x3bd   :  { %v2208_v29 = vpop.eup %2207 }
 0x3be   :  { %v1817_v1 = vmul.f32 %v2208_v29, %v3663_v24 }
 0x3bf   :  { %v1761_v58 = vpop.xlane.xlu0 %1760 }
 0x3c0   :  { %1874 = vst [vmem:[%s3897_s8 + $0x60] sm:$0xff] %v1817_v1  ;;  %2215 = vrcp.f32 %v1761_v58 }
 0x3c1   :  { %v2210_v39 = vpop.eup %2209 }
 0x3c2   :  { %v1819_v19 = vmul.f32 %v2210_v39, %v3667_v45 }
 0x3c3   :  { %v1763_v18 = vpop.xlane.xlu1 %1762 }
 0x3c4   :  { %1875 = vst [vmem:[%s3897_s8 + $0x70] sm:$0xff] %v1819_v19  ;;  %2217 = vrcp.f32 %v1763_v18 }
 0x3c5   :  { %v2212_v41 = vpop.eup %2211 }
 0x3c6   :  { %v1821_v10 = vmul.f32 %v2212_v41, %v3671_v47 }
 0x3c7   :  { %v1765_v3 = vpop.xlane.xlu0 %1764 }
 0x3c8   :  { %1876 = vst [vmem:[%s3897_s8 + $0x80] sm:$0xff] %v1821_v10  ;;  %2219 = vrcp.f32 %v1765_v3 }
 0x3c9   :  { %v2214_v24 = vpop.eup %2213 }
 0x3ca   :  { %v1823_v20 = vmul.f32 %v2214_v24, %v3675_v22 }
 0x3cb   :  { %v1767_v2 = vpop.xlane.xlu1 %1766 }
 0x3cc   :  { %1877 = vst [vmem:[%s3897_s8 + $0x90] sm:$0xff] %v1823_v20  ;;  %2221 = vrcp.f32 %v1767_v2 }
 0x3cd   :  { %v2216_v45 = vpop.eup %2215 }
 0x3ce   :  { %v1825_v15 = vmul.f32 %v2216_v45, %v3679_v53 }
 0x3cf   :  { %v1769_v16 = vpop.xlane.xlu0 %1768 }
 0x3d0   :  { %1878 = vst [vmem:[%s3897_s8 + $0xa0] sm:$0xff] %v1825_v15  ;;  %2223 = vrcp.f32 %v1769_v16 }
 0x3d1   :  { %v2218_v47 = vpop.eup %2217 }
 0x3d2   :  { %v1827_v63 = vmul.f32 %v2218_v47, %v3683_v14 }
 0x3d3   :  { %v1771_v52 = vpop.xlane.xlu1 %1770 }
 0x3d4   :  { %1879 = vst [vmem:[%s3897_s8 + $0xb0] sm:$0xff] %v1827_v63  ;;  %2225 = vrcp.f32 %v1771_v52 }
 0x3d5   :  { %v2220_v22 = vpop.eup %2219 }
 0x3d6   :  { %v1829_v37 = vmul.f32 %v2220_v22, %v3687_v30 }
 0x3d7   :  { %v1773_v28 = vpop.xlane.xlu0 %1772 }
 0x3d8   :  { %1880 = vst [vmem:[%s3897_s8 + $0xc0] sm:$0xff] %v1829_v37  ;;  %2227 = vrcp.f32 %v1773_v28 }
 0x3d9   :  { %v2222_v53 = vpop.eup %2221 }
 0x3da   :  { %v1831_v36 = vmul.f32 %v2222_v53, %v3691_v57 }
 0x3db   :  { %v1775_v27 = vpop.xlane.xlu1 %1774 }
 0x3dc   :  { %1881 = vst [vmem:[%s3897_s8 + $0xd0] sm:$0xff] %v1831_v36  ;;  %2229 = vrcp.f32 %v1775_v27 }
 0x3dd   :  { %v2224_v14 = vpop.eup %2223 }
 0x3de   :  { %v1833_v6 = vmul.f32 %v2224_v14, %v3695_v49 }
 0x3df   :  { %v1777_v59 = vpop.xlane.xlu0 %1776 }
 0x3e0   :  { %1882 = vst [vmem:[%s3897_s8 + $0xe0] sm:$0xff] %v1833_v6  ;;  %2231 = vrcp.f32 %v1777_v59 }
 0x3e1   :  { %v2226_v30 = vpop.eup %2225 }
 0x3e2   :  { %v1835_v56 = vmul.f32 %v2226_v30, %v3699_v62 }
 0x3e3   :  { %v1779_v4 = vpop.xlane.xlu1 %1778 }
 0x3e4   :  { %1883 = vst [vmem:[%s3897_s8 + $0xf0] sm:$0xff] %v1835_v56  ;;  %2233 = vrcp.f32 %v1779_v4 }
 0x3e5   :  { %v2228_v57 = vpop.eup %2227 }
 0x3e6   :  { %v1837_v23 = vmul.f32 %v2228_v57, %v3703_v44 }
 0x3e7   :  { %v1781_v43 = vpop.xlane.xlu0 %1780 }
 0x3e8   :  { %1884 = vst [vmem:[%s3897_s8 + $0x100] sm:$0xff] %v1837_v23  ;;  %2235 = vrcp.f32 %v1781_v43 }
 0x3e9   :  { %v2230_v49 = vpop.eup %2229 }
 0x3ea   :  { %v1839_v12 = vmul.f32 %v2230_v49, %v3707_v33 }
 0x3eb   :  { %v1783_v40 = vpop.xlane.xlu1 %1782 }
 0x3ec   :  { %1885 = vst [vmem:[%s3897_s8 + $0x110] sm:$0xff] %v1839_v12  ;;  %2237 = vrcp.f32 %v1783_v40 }
 0x3ed   :  { %v2232_v62 = vpop.eup %2231 }
 0x3ee   :  { %v1841_v60 = vmul.f32 %v2232_v62, %v3711_v8 }
 0x3ef   :  { %v1785_v21 = vpop.xlane.xlu0 %1784 }
 0x3f0   :  { %1886 = vst [vmem:[%s3897_s8 + $0x120] sm:$0xff] %v1841_v60  ;;  %2239 = vrcp.f32 %v1785_v21 }
 0x3f1   :  { %v2234_v44 = vpop.eup %2233 }
 0x3f2   :  { %v1843_v38 = vmul.f32 %v2234_v44, %v3715_v0 }
 0x3f3   :  { %v1787_v31 = vpop.xlane.xlu1 %1786 }
 0x3f4   :  { %1887 = vst [vmem:[%s3897_s8 + $0x130] sm:$0xff] %v1843_v38  ;;  %2241 = vrcp.f32 %v1787_v31 }
 0x3f5   :  { %v2236_v33 = vpop.eup %2235 }
 0x3f6   :  { %v1845_v5 = vmul.f32 %v2236_v33, %v3719_v25 }
 0x3f7   :  { %v1789_v48 = vpop.xlane.xlu0 %1788 }
 0x3f8   :  { %1888 = vst [vmem:[%s3897_s8 + $0x140] sm:$0xff] %v1845_v5  ;;  %2243 = vrcp.f32 %v1789_v48 }
 0x3f9   :  { %v2238_v8 = vpop.eup %2237 }
 0x3fa   :  { %v1847_v55 = vmul.f32 %v2238_v8, %v3723_v61 }
 0x3fb   :  { %v1791_v51 = vpop.xlane.xlu1 %1790 }
 0x3fc   :  { %1889 = vst [vmem:[%s3897_s8 + $0x150] sm:$0xff] %v1847_v55  ;;  %2245 = vrcp.f32 %v1791_v51 }
 0x3fd   :  { %v2240_v0 = vpop.eup %2239 }
 0x3fe   :  { %v1849_v7 = vmul.f32 %v2240_v0, %v3727_v11 }
 0x3ff   :  { %v1793_v26 = vpop.xlane.xlu0 %1792 }
 0x400   :  { %1890 = vst [vmem:[%s3897_s8 + $0x160] sm:$0xff] %v1849_v7  ;;  %2247 = vrcp.f32 %v1793_v26 }
 0x401   :  { %v2242_v25 = vpop.eup %2241 }
 0x402   :  { %v1851_v9 = vmul.f32 %v2242_v25, %v3731_v34 }
 0x403   :  { %v1795_v29 = vpop.xlane.xlu1 %1794 }
 0x404   :  { %1891 = vst [vmem:[%s3897_s8 + $0x170] sm:$0xff] %v1851_v9  ;;  %2249 = vrcp.f32 %v1795_v29 }
 0x405   :  { %v2244_v61 = vpop.eup %2243 }
 0x406   :  { %v1853_v1 = vmul.f32 %v2244_v61, %v3735_v17 }
 0x407   :  { %v1797_v58 = vpop.xlane.xlu0 %1796 }
 0x408   :  { %1892 = vst [vmem:[%s3897_s8 + $0x180] sm:$0xff] %v1853_v1  ;;  %2251 = vrcp.f32 %v1797_v58 }
 0x409   :  { %v2246_v11 = vpop.eup %2245 }
 0x40a   :  { %v1855_v39 = vmul.f32 %v2246_v11, %v3739_v46 }
 0x40b   :  { %v1799_v19 = vpop.xlane.xlu1 %1798 }
 0x40c   :  { %1893 = vst [vmem:[%s3897_s8 + $0x190] sm:$0xff] %v1855_v39  ;;  %2253 = vrcp.f32 %v1799_v19 }
 0x40d   :  { %v2248_v34 = vpop.eup %2247 }
 0x40e   :  { %v1857_v18 = vmul.f32 %v2248_v34, %v3743_v42 }
 0x40f   :  { %v1801_v41 = vpop.xlane.xlu0 %1800 }
 0x410   :  { %1894 = vst [vmem:[%s3897_s8 + $0x1a0] sm:$0xff] %v1857_v18  ;;  %2255 = vrcp.f32 %v1801_v41 }
 0x411   :  { %v2250_v17 = vpop.eup %2249 }
 0x412   :  { %v1859_v10 = vmul.f32 %v2250_v17, %v3747_v35 }
 0x413   :  { %v1803_v3 = vpop.xlane.xlu1 %1802 }
 0x414   :  { %1895 = vst [vmem:[%s3897_s8 + $0x1b0] sm:$0xff] %v1859_v10  ;;  %2257 = vrcp.f32 %v1803_v3 }
 0x415   :  { %v2252_v46 = vpop.eup %2251 }
 0x416   :  { %v1861_v24 = vmul.f32 %v2252_v46, %v3750_v50 }
 0x418   :  { %1896 = vst [vmem:[%s3897_s8 + $0x1c0] sm:$0xff] %v1861_v24 }
 0x419   :  { %v2254_v42 = vpop.eup %2253 }
 0x41a   :  { %v1863_v20 = vmul.f32 %v2254_v42, %v3753_v13 }
 0x41c   :  { %1897 = vst [vmem:[%s3897_s8 + $0x1d0] sm:$0xff] %v1863_v20 }
 0x41d   :  { %v2256_v35 = vpop.eup %2255 }
 0x41e   :  { %v1865_v2 = vmul.f32 %v2256_v35, %v3756_v54 }
 0x420   :  { %1898 = vst [vmem:[%s3897_s8 + $0x1e0] sm:$0xff] %v1865_v2 }
 0x421   :  { %v2258_v45 = vpop.eup %2257 }
 0x422   :  { %v1867_v50 = vmul.f32 %v2258_v45, %v3759_v32 }
 0x424   :  { %1899 = vst [vmem:[%s3897_s8 + $0x1f0] sm:$0xff] %v1867_v50 }

</bundles_post_ra>
